<compile_context>
chip_gen: v5e
topology: v5e:2x2
jax: 0.10.0
libtpu: 0.0.40
codegen_flags: <defaults>
</compile_context>

<pallas_src>
import functools
import math

import jax
import jax.numpy as jnp
from jax.experimental import pallas as pl
from jax.experimental.pallas import tpu as pltpu

_EPS = 1e-5  # nn.InstanceNorm2d default eps

# Output-row phase a uses input-row offsets dy with kernel row ky:
#   y = 2i   -> (dy=0,  ky=1), (dy=-1, ky=3)
#   y = 2i+1 -> (dy=+1, ky=0), (dy=0,  ky=2)
# (identical table for columns / kx).
_PHASE_TAPS = {0: ((0, 1), (-1, 3)), 1: ((1, 0), (0, 2))}

# Fixed ordering of the 9 (dy, dx) shifted input views shared by all phases.
_DELTAS = tuple((dy, dx) for dy in (-1, 0, 1) for dx in (-1, 0, 1))


def _stacked_phase_weights(w_kkio):
    """(4,4,Cin,Cout) -> (2,2,Cout,9*Cin) tap-folded weight slab per phase."""
    cin, cout = w_kkio.shape[2], w_kkio.shape[3]
    zeros = jnp.zeros((cout, cin), w_kkio.dtype)
    phase_rows = []
    for a in (0, 1):
        cols = []
        for b in (0, 1):
            taps = {}
            for dy, ky in _PHASE_TAPS[a]:
                for dx, kx in _PHASE_TAPS[b]:
                    taps[(dy, dx)] = jnp.transpose(w_kkio[ky, kx])  # (Cout, Cin)
            blocks = [taps.get(d, zeros) for d in _DELTAS]
            cols.append(jnp.concatenate(blocks, axis=1))            # (Cout, 9*Cin)
        phase_rows.append(jnp.stack(cols, axis=0))
    return jnp.stack(phase_rows, axis=0)                            # (2,2,Cout,9*Cin)


def _trans_up_kernel(x_ref, w_ref, out_ref, *, H, W, Cin, Cout):
    # x_ref  : (1, Cin, H*W)        unpadded flat-NCHW input, one batch element
    # w_ref  : (2, 2, Cout, 9*Cin)  per-phase tap-folded weights
    # out_ref: (1, 2, 2, Cout, H*W) phase-separated conv -> IN -> GELU output
    HW = H * W
    x = x_ref[0].astype(jnp.float32)                                # (Cin, HW)

    # Lane-pad the flat input by one full row (+1) on each side so every (dy,dx)
    # shift is a plain static lane slice; only column wrap-around needs masking
    # (row out-of-bounds lands in the zero padding automatically).
    pad = W + 1
    zpad = jnp.zeros((Cin, pad), jnp.float32)
    xp = jnp.concatenate([zpad, x, zpad], axis=1)                   # (Cin, HW+2W+2)

    col = jax.lax.broadcasted_iota(jnp.int32, (1, HW), 1) % W       # lane -> j index

    shifted = []
    for dy, dx in _DELTAS:
        start = pad + dy * W + dx
        s = xp[:, start:start + HW]                                 # (Cin, HW)
        if dx == 1:
            s = jnp.where(col < W - 1, s, 0.0)
        elif dx == -1:
            s = jnp.where(col >= 1, s, 0.0)
        shifted.append(s)
    rhs = jnp.concatenate(shifted, axis=0)                          # (9*Cin, HW)

    # Pass 1: one MXU matmul per phase; stage the raw (f32) conv results in the
    # output block and accumulate single-pass InstanceNorm statistics.
    ssum = jnp.zeros((Cout, 1), jnp.float32)
    ssq = jnp.zeros((Cout, 1), jnp.float32)
    for a in (0, 1):
        for b in (0, 1):
            acc = jnp.dot(w_ref[a, b], rhs,
                          preferred_element_type=jnp.float32)       # (Cout, HW)
            ssum = ssum + jnp.sum(acc, axis=1, keepdims=True)
            ssq = ssq + jnp.sum(acc * acc, axis=1, keepdims=True)
            out_ref[0, a, b] = acc

    inv_n = 1.0 / (4.0 * HW)
    mean = ssum * inv_n                                             # (Cout, 1)
    var = ssq * inv_n - mean * mean          # biased variance == InstanceNorm2d
    inv_std = jax.lax.rsqrt(var + _EPS)

    # Pass 2: normalize + exact (erf) GELU, re-reading the staged conv results.
    inv_sqrt2 = 0.7071067811865476
    for a in (0, 1):
        for b in (0, 1):
            y = (out_ref[0, a, b] - mean) * inv_std
            out_ref[0, a, b] = 0.5 * y * (1.0 + jax.lax.erf(y * inv_sqrt2))


def trans_up(x_nchw, w_torch):
    """x_nchw: (N, Cin, H, W); w_torch: (Cin, Cout, 4, 4) PyTorch ConvTranspose2d weight."""
    N, Cin, H, W = x_nchw.shape
    Cout = w_torch.shape[1]
    HW = H * W

    x_flat = x_nchw.reshape(N, Cin, HW)                             # free reshape
    w_kkio = jnp.transpose(w_torch, (2, 3, 0, 1)).astype(jnp.float32)  # (ky,kx,Cin,Cout)
    w_stk = _stacked_phase_weights(w_kkio)                          # (2,2,Cout,9*Cin)

    # Generation-aware VMEM limit (~96 MiB on v5e/v6e, ~48 MiB on v7x).
    try:
        vmem_limit = int(pltpu.get_tpu_info().vmem_capacity_bytes * 3 // 4)
    except Exception:
        vmem_limit = 48 * 1024 * 1024

    kernel = functools.partial(_trans_up_kernel, H=H, W=W, Cin=Cin, Cout=Cout)
    # TODO(synk): for very large H*W*Cout (v7x: 64 MiB VMEM, 2 TensorCores) add a
    # spatial-tile grid axis with a two-pass (partial-stats) InstanceNorm scheme.
    phases = pl.pallas_call(
        kernel,
        out_shape=jax.ShapeDtypeStruct((N, 2, 2, Cout, HW), jnp.float32),
        grid_spec=pltpu.PrefetchScalarGridSpec(
            num_scalar_prefetch=0,
            grid=(N,),
            in_specs=[
                pl.BlockSpec((1, Cin, HW), lambda n: (n, 0, 0)),
                pl.BlockSpec((2, 2, Cout, 9 * Cin), lambda n: (0, 0, 0, 0)),
            ],
            out_specs=pl.BlockSpec((1, 2, 2, Cout, HW),
                                   lambda n: (n, 0, 0, 0, 0)),
        ),
        compiler_params=pltpu.CompilerParams(
            dimension_semantics=("parallel",),
            vmem_limit_bytes=vmem_limit,
        ),
    )(x_flat, w_stk)

    # Phase interleave: out[n, c, 2i+a, 2j+b] = phases[n, a, b, c, i, j].
    out = phases.reshape(N, 2, 2, Cout, H, W)
    out = jnp.transpose(out, (0, 3, 4, 1, 5, 2))                    # (N, Cout, H, 2, W, 2)
    return out.reshape(N, Cout, 2 * H, 2 * W)                       # NCHW


def _reference(x_nchw, w_torch):
    """Pure-JAX reference: conv_transpose (via lhs dilation) + InstanceNorm + exact GELU."""
    w_flip = w_torch[:, :, ::-1, ::-1]
    w_oihw = jnp.transpose(w_flip, (1, 0, 2, 3))                    # (Cout, Cin, 4, 4)
    conv = jax.lax.conv_general_dilated(
        x_nchw, w_oihw, window_strides=(1, 1),
        padding=((2, 2), (2, 2)), lhs_dilation=(2, 2),
        dimension_numbers=("NCHW", "OIHW", "NCHW"))
    mean = conv.mean(axis=(2, 3), keepdims=True)
    var = conv.var(axis=(2, 3), keepdims=True)
    y = (conv - mean) * jax.lax.rsqrt(var + _EPS)
    return 0.5 * y * (1.0 + jax.lax.erf(y / jnp.sqrt(2.0)))


if __name__ == "__main__":
    key = jax.random.PRNGKey(0)
    kx, kw = jax.random.split(key)

    N, Cin, Cout, H, W = 2, 4, 8, 16, 16
    x = jax.random.normal(kx, (N, Cin, H, W), jnp.float32)
    # Deterministic ConvTranspose2d weight, PyTorch layout (in_planes, out_planes, kH, kW)
    bound = 1.0 / math.sqrt(Cin * 4 * 4)
    w = jax.random.uniform(kw, (Cin, Cout, 4, 4), jnp.float32, -bound, bound)

    out = jax.block_until_ready(trans_up(x, w))
    assert out.shape == (N, Cout, 2 * H, 2 * W), out.shape

    ref = jax.block_until_ready(_reference(x, w))
    err = float(jnp.max(jnp.abs(out - ref)))
    assert err < 1e-2, f"max abs err vs reference: {err}"

    print("KERNEL_OK")
</pallas_src>

<mosaic_0001>
module attributes {stable_mosaic.version = 11 : i64} {
  func.func @_trans_up_kernel(%arg0: i32, %arg1: memref<1x4x256xf32, #tpu.memory_space<vmem>>, %arg2: memref<2x2x8x36xf32, #tpu.memory_space<vmem>>, %arg3: memref<1x2x2x8x256xf32, #tpu.memory_space<vmem>>) attributes {dimension_semantics = [#tpu.dimension_semantics<parallel>], iteration_bounds = array<i64: 2>, scalar_prefetch = 0 : i64, scratch_operands = 0 : i64, tpu.core_type = #tpu.core_type<tc>, window_params = [{transform_indices = @transform_0, window_bounds = array<i64: 1, 4, 256>}, {pipeline_mode = #tpu.pipeline_mode<synchronous>, transform_indices = @transform_1, window_bounds = array<i64: 2, 2, 8, 36>}, {transform_indices = @transform_2, window_bounds = array<i64: 1, 2, 2, 8, 256>}]} {
    %c0 = arith.constant 0 : index
    %c0_0 = arith.constant 0 : index
    %c0_1 = arith.constant 0 : index
    %0 = vector.load %arg1[%c0, %c0_0, %c0_1] : memref<1x4x256xf32, #tpu.memory_space<vmem>>, vector<1x4x256xf32>
    %1 = vector.shape_cast %0 : vector<1x4x256xf32> to vector<4x256xf32>
    %cst = arith.constant 0.000000e+00 : f32
    %2 = vector.broadcast %cst : f32 to vector<4x17xf32>
    %3 = tpu.concatenate %2, %1, %2 in 1 : vector<4x17xf32>, vector<4x256xf32>, vector<4x17xf32> -> vector<4x290xf32>
    %4 = tpu.iota {dimensions = array<i32: 1>} : vector<1x256xi32>
    %c16_i32 = arith.constant 16 : i32
    %c0_i32 = arith.constant 0 : i32
    %5 = arith.cmpi eq, %c16_i32, %c0_i32 : i32
    %c1_i32 = arith.constant 1 : i32
    %6 = arith.select %5, %c1_i32, %c16_i32 : i32
    %7 = vector.broadcast %6 : i32 to vector<1x256xi32>
    %8 = arith.remsi %4, %7 : vector<1x256xi32>
    %c0_i32_2 = arith.constant 0 : i32
    %9 = vector.broadcast %c0_i32_2 : i32 to vector<1x256xi32>
    %10 = arith.cmpi ne, %8, %9 : vector<1x256xi32>
    %c0_i32_3 = arith.constant 0 : i32
    %11 = vector.broadcast %c0_i32_3 : i32 to vector<1x256xi32>
    %12 = arith.cmpi slt, %8, %11 : vector<1x256xi32>
    %c0_i32_4 = arith.constant 0 : i32
    %13 = arith.cmpi slt, %6, %c0_i32_4 : i32
    %14 = vector.broadcast %13 : i1 to vector<1x256xi1>
    %15 = vector.broadcast %14 : vector<1x256xi1> to vector<1x256xi1>
    %16 = arith.xori %12, %15 : vector<1x256xi1>
    %17 = arith.andi %16, %10 : vector<1x256xi1>
    %18 = vector.broadcast %6 : i32 to vector<1x256xi32>
    %19 = arith.addi %8, %18 : vector<1x256xi32>
    %20 = arith.select %17, %19, %8 : vector<1x256xi1>, vector<1x256xi32>
    %21 = vector.extract_strided_slice %3 {offsets = [0, 0], sizes = [4, 256], strides = [1, 1]} : vector<4x290xf32> to vector<4x256xf32>
    %c1_i32_5 = arith.constant 1 : i32
    %22 = vector.broadcast %c1_i32_5 : i32 to vector<1x256xi32>
    %23 = arith.cmpi sge, %20, %22 : vector<1x256xi32>
    %cst_6 = arith.constant 0.000000e+00 : f32
    %24 = vector.shape_cast %23 : vector<1x256xi1> to vector<1x256xi1>
    %25 = vector.broadcast %24 : vector<1x256xi1> to vector<4x256xi1>
    %26 = vector.broadcast %cst_6 : f32 to vector<4x256xf32>
    %27 = arith.select %25, %21, %26 : vector<4x256xi1>, vector<4x256xf32>
    %28 = vector.extract_strided_slice %3 {offsets = [0, 1], sizes = [4, 256], strides = [1, 1]} : vector<4x290xf32> to vector<4x256xf32>
    %29 = vector.extract_strided_slice %3 {offsets = [0, 2], sizes = [4, 256], strides = [1, 1]} : vector<4x290xf32> to vector<4x256xf32>
    %c15_i32 = arith.constant 15 : i32
    %30 = vector.broadcast %c15_i32 : i32 to vector<1x256xi32>
    %31 = arith.cmpi slt, %20, %30 : vector<1x256xi32>
    %cst_7 = arith.constant 0.000000e+00 : f32
    %32 = vector.shape_cast %31 : vector<1x256xi1> to vector<1x256xi1>
    %33 = vector.broadcast %32 : vector<1x256xi1> to vector<4x256xi1>
    %34 = vector.broadcast %cst_7 : f32 to vector<4x256xf32>
    %35 = arith.select %33, %29, %34 : vector<4x256xi1>, vector<4x256xf32>
    %36 = vector.extract_strided_slice %3 {offsets = [0, 16], sizes = [4, 256], strides = [1, 1]} : vector<4x290xf32> to vector<4x256xf32>
    %c1_i32_8 = arith.constant 1 : i32
    %37 = vector.broadcast %c1_i32_8 : i32 to vector<1x256xi32>
    %38 = arith.cmpi sge, %20, %37 : vector<1x256xi32>
    %cst_9 = arith.constant 0.000000e+00 : f32
    %39 = vector.shape_cast %38 : vector<1x256xi1> to vector<1x256xi1>
    %40 = vector.broadcast %39 : vector<1x256xi1> to vector<4x256xi1>
    %41 = vector.broadcast %cst_9 : f32 to vector<4x256xf32>
    %42 = arith.select %40, %36, %41 : vector<4x256xi1>, vector<4x256xf32>
    %43 = vector.extract_strided_slice %3 {offsets = [0, 17], sizes = [4, 256], strides = [1, 1]} : vector<4x290xf32> to vector<4x256xf32>
    %44 = vector.extract_strided_slice %3 {offsets = [0, 18], sizes = [4, 256], strides = [1, 1]} : vector<4x290xf32> to vector<4x256xf32>
    %c15_i32_10 = arith.constant 15 : i32
    %45 = vector.broadcast %c15_i32_10 : i32 to vector<1x256xi32>
    %46 = arith.cmpi slt, %20, %45 : vector<1x256xi32>
    %cst_11 = arith.constant 0.000000e+00 : f32
    %47 = vector.shape_cast %46 : vector<1x256xi1> to vector<1x256xi1>
    %48 = vector.broadcast %47 : vector<1x256xi1> to vector<4x256xi1>
    %49 = vector.broadcast %cst_11 : f32 to vector<4x256xf32>
    %50 = arith.select %48, %44, %49 : vector<4x256xi1>, vector<4x256xf32>
    %51 = vector.extract_strided_slice %3 {offsets = [0, 32], sizes = [4, 256], strides = [1, 1]} : vector<4x290xf32> to vector<4x256xf32>
    %c1_i32_12 = arith.constant 1 : i32
    %52 = vector.broadcast %c1_i32_12 : i32 to vector<1x256xi32>
    %53 = arith.cmpi sge, %20, %52 : vector<1x256xi32>
    %cst_13 = arith.constant 0.000000e+00 : f32
    %54 = vector.shape_cast %53 : vector<1x256xi1> to vector<1x256xi1>
    %55 = vector.broadcast %54 : vector<1x256xi1> to vector<4x256xi1>
    %56 = vector.broadcast %cst_13 : f32 to vector<4x256xf32>
    %57 = arith.select %55, %51, %56 : vector<4x256xi1>, vector<4x256xf32>
    %58 = vector.extract_strided_slice %3 {offsets = [0, 33], sizes = [4, 256], strides = [1, 1]} : vector<4x290xf32> to vector<4x256xf32>
    %59 = vector.extract_strided_slice %3 {offsets = [0, 34], sizes = [4, 256], strides = [1, 1]} : vector<4x290xf32> to vector<4x256xf32>
    %c15_i32_14 = arith.constant 15 : i32
    %60 = vector.broadcast %c15_i32_14 : i32 to vector<1x256xi32>
    %61 = arith.cmpi slt, %20, %60 : vector<1x256xi32>
    %cst_15 = arith.constant 0.000000e+00 : f32
    %62 = vector.shape_cast %61 : vector<1x256xi1> to vector<1x256xi1>
    %63 = vector.broadcast %62 : vector<1x256xi1> to vector<4x256xi1>
    %64 = vector.broadcast %cst_15 : f32 to vector<4x256xf32>
    %65 = arith.select %63, %59, %64 : vector<4x256xi1>, vector<4x256xf32>
    %66 = tpu.concatenate %27, %28, %35, %42, %43, %50, %57, %58, %65 in 0 : vector<4x256xf32>, vector<4x256xf32>, vector<4x256xf32>, vector<4x256xf32>, vector<4x256xf32>, vector<4x256xf32>, vector<4x256xf32>, vector<4x256xf32>, vector<4x256xf32> -> vector<36x256xf32>
    %cst_16 = arith.constant 0.000000e+00 : f32
    %67 = vector.broadcast %cst_16 : f32 to vector<8x1xf32>
    %cst_17 = arith.constant 0.000000e+00 : f32
    %68 = vector.broadcast %cst_17 : f32 to vector<8x1xf32>
    %c0_18 = arith.constant 0 : index
    %c0_19 = arith.constant 0 : index
    %c0_20 = arith.constant 0 : index
    %c0_21 = arith.constant 0 : index
    %69 = vector.load %arg2[%c0_18, %c0_19, %c0_20, %c0_21] : memref<2x2x8x36xf32, #tpu.memory_space<vmem>>, vector<1x1x8x36xf32>
    %70 = vector.shape_cast %69 : vector<1x1x8x36xf32> to vector<8x36xf32>
    %cst_22 = arith.constant dense<0.000000e+00> : vector<8x256xf32>
    %71 = tpu.matmul %70, %66, %cst_22 {dimension_numbers = #tpu.dot_dimension_numbers<[1], [0], [0], [1], [0, 0, 1, 1], [], []>} : vector<8x36xf32>, vector<36x256xf32>, vector<8x256xf32> -> vector<8x256xf32>
    %cst_23 = arith.constant dense<0.000000e+00> : vector<8xf32>
    %72 = vector.multi_reduction <add>, %71, %cst_23 [1] : vector<8x256xf32> to vector<8xf32>
    %73 = vector.shape_cast %72 : vector<8xf32> to vector<8x1xf32>
    %74 = arith.addf %67, %73 : vector<8x1xf32>
    %75 = arith.mulf %71, %71 : vector<8x256xf32>
    %cst_24 = arith.constant dense<0.000000e+00> : vector<8xf32>
    %76 = vector.multi_reduction <add>, %75, %cst_24 [1] : vector<8x256xf32> to vector<8xf32>
    %77 = vector.shape_cast %76 : vector<8xf32> to vector<8x1xf32>
    %78 = arith.addf %68, %77 : vector<8x1xf32>
    %c0_25 = arith.constant 0 : index
    %c0_26 = arith.constant 0 : index
    %c0_27 = arith.constant 0 : index
    %c0_28 = arith.constant 0 : index
    %c0_29 = arith.constant 0 : index
    %79 = vector.load %arg3[%c0_25, %c0_26, %c0_27, %c0_28, %c0_29] : memref<1x2x2x8x256xf32, #tpu.memory_space<vmem>>, vector<1x1x1x8x256xf32>
    %80 = vector.shape_cast %79 : vector<1x1x1x8x256xf32> to vector<8x256xf32>
    %81 = vector.shape_cast %71 : vector<8x256xf32> to vector<1x1x1x8x256xf32>
    tpu.vector_store %arg3[%c0_25, %c0_26, %c0_27, %c0_28, %c0_29], %81 {strides = array<i32>} : memref<1x2x2x8x256xf32, #tpu.memory_space<vmem>>, vector<1x1x1x8x256xf32>,
    %c0_30 = arith.constant 0 : index
    %c1 = arith.constant 1 : index
    %c0_31 = arith.constant 0 : index
    %c0_32 = arith.constant 0 : index
    %82 = vector.load %arg2[%c0_30, %c1, %c0_31, %c0_32] : memref<2x2x8x36xf32, #tpu.memory_space<vmem>>, vector<1x1x8x36xf32>
    %83 = vector.shape_cast %82 : vector<1x1x8x36xf32> to vector<8x36xf32>
    %cst_33 = arith.constant dense<0.000000e+00> : vector<8x256xf32>
    %84 = tpu.matmul %83, %66, %cst_33 {dimension_numbers = #tpu.dot_dimension_numbers<[1], [0], [0], [1], [0, 0, 1, 1], [], []>} : vector<8x36xf32>, vector<36x256xf32>, vector<8x256xf32> -> vector<8x256xf32>
    %cst_34 = arith.constant dense<0.000000e+00> : vector<8xf32>
    %85 = vector.multi_reduction <add>, %84, %cst_34 [1] : vector<8x256xf32> to vector<8xf32>
    %86 = vector.shape_cast %85 : vector<8xf32> to vector<8x1xf32>
    %87 = arith.addf %74, %86 : vector<8x1xf32>
    %88 = arith.mulf %84, %84 : vector<8x256xf32>
    %cst_35 = arith.constant dense<0.000000e+00> : vector<8xf32>
    %89 = vector.multi_reduction <add>, %88, %cst_35 [1] : vector<8x256xf32> to vector<8xf32>
    %90 = vector.shape_cast %89 : vector<8xf32> to vector<8x1xf32>
    %91 = arith.addf %78, %90 : vector<8x1xf32>
    %c0_36 = arith.constant 0 : index
    %c0_37 = arith.constant 0 : index
    %c1_38 = arith.constant 1 : index
    %c0_39 = arith.constant 0 : index
    %c0_40 = arith.constant 0 : index
    %92 = vector.load %arg3[%c0_36, %c0_37, %c1_38, %c0_39, %c0_40] : memref<1x2x2x8x256xf32, #tpu.memory_space<vmem>>, vector<1x1x1x8x256xf32>
    %93 = vector.shape_cast %92 : vector<1x1x1x8x256xf32> to vector<8x256xf32>
    %94 = vector.shape_cast %84 : vector<8x256xf32> to vector<1x1x1x8x256xf32>
    tpu.vector_store %arg3[%c0_36, %c0_37, %c1_38, %c0_39, %c0_40], %94 {strides = array<i32>} : memref<1x2x2x8x256xf32, #tpu.memory_space<vmem>>, vector<1x1x1x8x256xf32>,
    %c1_41 = arith.constant 1 : index
    %c0_42 = arith.constant 0 : index
    %c0_43 = arith.constant 0 : index
    %c0_44 = arith.constant 0 : index
    %95 = vector.load %arg2[%c1_41, %c0_42, %c0_43, %c0_44] : memref<2x2x8x36xf32, #tpu.memory_space<vmem>>, vector<1x1x8x36xf32>
    %96 = vector.shape_cast %95 : vector<1x1x8x36xf32> to vector<8x36xf32>
    %cst_45 = arith.constant dense<0.000000e+00> : vector<8x256xf32>
    %97 = tpu.matmul %96, %66, %cst_45 {dimension_numbers = #tpu.dot_dimension_numbers<[1], [0], [0], [1], [0, 0, 1, 1], [], []>} : vector<8x36xf32>, vector<36x256xf32>, vector<8x256xf32> -> vector<8x256xf32>
    %cst_46 = arith.constant dense<0.000000e+00> : vector<8xf32>
    %98 = vector.multi_reduction <add>, %97, %cst_46 [1] : vector<8x256xf32> to vector<8xf32>
    %99 = vector.shape_cast %98 : vector<8xf32> to vector<8x1xf32>
    %100 = arith.addf %87, %99 : vector<8x1xf32>
    %101 = arith.mulf %97, %97 : vector<8x256xf32>
    %cst_47 = arith.constant dense<0.000000e+00> : vector<8xf32>
    %102 = vector.multi_reduction <add>, %101, %cst_47 [1] : vector<8x256xf32> to vector<8xf32>
    %103 = vector.shape_cast %102 : vector<8xf32> to vector<8x1xf32>
    %104 = arith.addf %91, %103 : vector<8x1xf32>
    %c0_48 = arith.constant 0 : index
    %c1_49 = arith.constant 1 : index
    %c0_50 = arith.constant 0 : index
    %c0_51 = arith.constant 0 : index
    %c0_52 = arith.constant 0 : index
    %105 = vector.load %arg3[%c0_48, %c1_49, %c0_50, %c0_51, %c0_52] : memref<1x2x2x8x256xf32, #tpu.memory_space<vmem>>, vector<1x1x1x8x256xf32>
    %106 = vector.shape_cast %105 : vector<1x1x1x8x256xf32> to vector<8x256xf32>
    %107 = vector.shape_cast %97 : vector<8x256xf32> to vector<1x1x1x8x256xf32>
    tpu.vector_store %arg3[%c0_48, %c1_49, %c0_50, %c0_51, %c0_52], %107 {strides = array<i32>} : memref<1x2x2x8x256xf32, #tpu.memory_space<vmem>>, vector<1x1x1x8x256xf32>,
    %c1_53 = arith.constant 1 : index
    %c1_54 = arith.constant 1 : index
    %c0_55 = arith.constant 0 : index
    %c0_56 = arith.constant 0 : index
    %108 = vector.load %arg2[%c1_53, %c1_54, %c0_55, %c0_56] : memref<2x2x8x36xf32, #tpu.memory_space<vmem>>, vector<1x1x8x36xf32>
    %109 = vector.shape_cast %108 : vector<1x1x8x36xf32> to vector<8x36xf32>
    %cst_57 = arith.constant dense<0.000000e+00> : vector<8x256xf32>
    %110 = tpu.matmul %109, %66, %cst_57 {dimension_numbers = #tpu.dot_dimension_numbers<[1], [0], [0], [1], [0, 0, 1, 1], [], []>} : vector<8x36xf32>, vector<36x256xf32>, vector<8x256xf32> -> vector<8x256xf32>
    %cst_58 = arith.constant dense<0.000000e+00> : vector<8xf32>
    %111 = vector.multi_reduction <add>, %110, %cst_58 [1] : vector<8x256xf32> to vector<8xf32>
    %112 = vector.shape_cast %111 : vector<8xf32> to vector<8x1xf32>
    %113 = arith.addf %100, %112 : vector<8x1xf32>
    %114 = arith.mulf %110, %110 : vector<8x256xf32>
    %cst_59 = arith.constant dense<0.000000e+00> : vector<8xf32>
    %115 = vector.multi_reduction <add>, %114, %cst_59 [1] : vector<8x256xf32> to vector<8xf32>
    %116 = vector.shape_cast %115 : vector<8xf32> to vector<8x1xf32>
    %117 = arith.addf %104, %116 : vector<8x1xf32>
    %c0_60 = arith.constant 0 : index
    %c1_61 = arith.constant 1 : index
    %c1_62 = arith.constant 1 : index
    %c0_63 = arith.constant 0 : index
    %c0_64 = arith.constant 0 : index
    %118 = vector.load %arg3[%c0_60, %c1_61, %c1_62, %c0_63, %c0_64] : memref<1x2x2x8x256xf32, #tpu.memory_space<vmem>>, vector<1x1x1x8x256xf32>
    %119 = vector.shape_cast %118 : vector<1x1x1x8x256xf32> to vector<8x256xf32>
    %120 = vector.shape_cast %110 : vector<8x256xf32> to vector<1x1x1x8x256xf32>
    tpu.vector_store %arg3[%c0_60, %c1_61, %c1_62, %c0_63, %c0_64], %120 {strides = array<i32>} : memref<1x2x2x8x256xf32, #tpu.memory_space<vmem>>, vector<1x1x1x8x256xf32>,
    %cst_65 = arith.constant 9.765625E-4 : f32
    %121 = vector.broadcast %cst_65 : f32 to vector<8x1xf32>
    %122 = arith.mulf %113, %121 : vector<8x1xf32>
    %cst_66 = arith.constant 9.765625E-4 : f32
    %123 = vector.broadcast %cst_66 : f32 to vector<8x1xf32>
    %124 = arith.mulf %117, %123 : vector<8x1xf32>
    %125 = arith.mulf %122, %122 : vector<8x1xf32>
    %126 = arith.subf %124, %125 : vector<8x1xf32>
    %cst_67 = arith.constant 9.99999974E-6 : f32
    %127 = vector.broadcast %cst_67 : f32 to vector<8x1xf32>
    %128 = arith.addf %126, %127 : vector<8x1xf32>
    %129 = math.rsqrt %128 : vector<8x1xf32>
    %c0_68 = arith.constant 0 : index
    %c0_69 = arith.constant 0 : index
    %c0_70 = arith.constant 0 : index
    %c0_71 = arith.constant 0 : index
    %c0_72 = arith.constant 0 : index
    %130 = vector.load %arg3[%c0_68, %c0_69, %c0_70, %c0_71, %c0_72] : memref<1x2x2x8x256xf32, #tpu.memory_space<vmem>>, vector<1x1x1x8x256xf32>
    %131 = vector.shape_cast %130 : vector<1x1x1x8x256xf32> to vector<8x256xf32>
    %132 = vector.broadcast %122 : vector<8x1xf32> to vector<8x256xf32>
    %133 = arith.subf %131, %132 : vector<8x256xf32>
    %134 = vector.broadcast %129 : vector<8x1xf32> to vector<8x256xf32>
    %135 = arith.mulf %133, %134 : vector<8x256xf32>
    %cst_73 = arith.constant 5.000000e-01 : f32
    %136 = vector.broadcast %cst_73 : f32 to vector<8x256xf32>
    %137 = arith.mulf %136, %135 : vector<8x256xf32>
    %cst_74 = arith.constant 0.707106769 : f32
    %138 = vector.broadcast %cst_74 : f32 to vector<8x256xf32>
    %139 = arith.mulf %135, %138 : vector<8x256xf32>
    %140 = math.erf %139 : vector<8x256xf32>
    %cst_75 = arith.constant 1.000000e+00 : f32
    %141 = vector.broadcast %cst_75 : f32 to vector<8x256xf32>
    %142 = arith.addf %141, %140 : vector<8x256xf32>
    %143 = arith.mulf %137, %142 : vector<8x256xf32>
    %c0_76 = arith.constant 0 : index
    %c0_77 = arith.constant 0 : index
    %c0_78 = arith.constant 0 : index
    %c0_79 = arith.constant 0 : index
    %c0_80 = arith.constant 0 : index
    %144 = vector.load %arg3[%c0_76, %c0_77, %c0_78, %c0_79, %c0_80] : memref<1x2x2x8x256xf32, #tpu.memory_space<vmem>>, vector<1x1x1x8x256xf32>
    %145 = vector.shape_cast %144 : vector<1x1x1x8x256xf32> to vector<8x256xf32>
    %146 = vector.shape_cast %143 : vector<8x256xf32> to vector<1x1x1x8x256xf32>
    tpu.vector_store %arg3[%c0_76, %c0_77, %c0_78, %c0_79, %c0_80], %146 {strides = array<i32>} : memref<1x2x2x8x256xf32, #tpu.memory_space<vmem>>, vector<1x1x1x8x256xf32>,
    %c0_81 = arith.constant 0 : index
    %c0_82 = arith.constant 0 : index
    %c1_83 = arith.constant 1 : index
    %c0_84 = arith.constant 0 : index
    %c0_85 = arith.constant 0 : index
    %147 = vector.load %arg3[%c0_81, %c0_82, %c1_83, %c0_84, %c0_85] : memref<1x2x2x8x256xf32, #tpu.memory_space<vmem>>, vector<1x1x1x8x256xf32>
    %148 = vector.shape_cast %147 : vector<1x1x1x8x256xf32> to vector<8x256xf32>
    %149 = vector.broadcast %122 : vector<8x1xf32> to vector<8x256xf32>
    %150 = arith.subf %148, %149 : vector<8x256xf32>
    %151 = vector.broadcast %129 : vector<8x1xf32> to vector<8x256xf32>
    %152 = arith.mulf %150, %151 : vector<8x256xf32>
    %cst_86 = arith.constant 5.000000e-01 : f32
    %153 = vector.broadcast %cst_86 : f32 to vector<8x256xf32>
    %154 = arith.mulf %153, %152 : vector<8x256xf32>
    %cst_87 = arith.constant 0.707106769 : f32
    %155 = vector.broadcast %cst_87 : f32 to vector<8x256xf32>
    %156 = arith.mulf %152, %155 : vector<8x256xf32>
    %157 = math.erf %156 : vector<8x256xf32>
    %cst_88 = arith.constant 1.000000e+00 : f32
    %158 = vector.broadcast %cst_88 : f32 to vector<8x256xf32>
    %159 = arith.addf %158, %157 : vector<8x256xf32>
    %160 = arith.mulf %154, %159 : vector<8x256xf32>
    %c0_89 = arith.constant 0 : index
    %c0_90 = arith.constant 0 : index
    %c1_91 = arith.constant 1 : index
    %c0_92 = arith.constant 0 : index
    %c0_93 = arith.constant 0 : index
    %161 = vector.load %arg3[%c0_89, %c0_90, %c1_91, %c0_92, %c0_93] : memref<1x2x2x8x256xf32, #tpu.memory_space<vmem>>, vector<1x1x1x8x256xf32>
    %162 = vector.shape_cast %161 : vector<1x1x1x8x256xf32> to vector<8x256xf32>
    %163 = vector.shape_cast %160 : vector<8x256xf32> to vector<1x1x1x8x256xf32>
    tpu.vector_store %arg3[%c0_89, %c0_90, %c1_91, %c0_92, %c0_93], %163 {strides = array<i32>} : memref<1x2x2x8x256xf32, #tpu.memory_space<vmem>>, vector<1x1x1x8x256xf32>,
    %c0_94 = arith.constant 0 : index
    %c1_95 = arith.constant 1 : index
    %c0_96 = arith.constant 0 : index
    %c0_97 = arith.constant 0 : index
    %c0_98 = arith.constant 0 : index
    %164 = vector.load %arg3[%c0_94, %c1_95, %c0_96, %c0_97, %c0_98] : memref<1x2x2x8x256xf32, #tpu.memory_space<vmem>>, vector<1x1x1x8x256xf32>
    %165 = vector.shape_cast %164 : vector<1x1x1x8x256xf32> to vector<8x256xf32>
    %166 = vector.broadcast %122 : vector<8x1xf32> to vector<8x256xf32>
    %167 = arith.subf %165, %166 : vector<8x256xf32>
    %168 = vector.broadcast %129 : vector<8x1xf32> to vector<8x256xf32>
    %169 = arith.mulf %167, %168 : vector<8x256xf32>
    %cst_99 = arith.constant 5.000000e-01 : f32
    %170 = vector.broadcast %cst_99 : f32 to vector<8x256xf32>
    %171 = arith.mulf %170, %169 : vector<8x256xf32>
    %cst_100 = arith.constant 0.707106769 : f32
    %172 = vector.broadcast %cst_100 : f32 to vector<8x256xf32>
    %173 = arith.mulf %169, %172 : vector<8x256xf32>
    %174 = math.erf %173 : vector<8x256xf32>
    %cst_101 = arith.constant 1.000000e+00 : f32
    %175 = vector.broadcast %cst_101 : f32 to vector<8x256xf32>
    %176 = arith.addf %175, %174 : vector<8x256xf32>
    %177 = arith.mulf %171, %176 : vector<8x256xf32>
    %c0_102 = arith.constant 0 : index
    %c1_103 = arith.constant 1 : index
    %c0_104 = arith.constant 0 : index
    %c0_105 = arith.constant 0 : index
    %c0_106 = arith.constant 0 : index
    %178 = vector.load %arg3[%c0_102, %c1_103, %c0_104, %c0_105, %c0_106] : memref<1x2x2x8x256xf32, #tpu.memory_space<vmem>>, vector<1x1x1x8x256xf32>
    %179 = vector.shape_cast %178 : vector<1x1x1x8x256xf32> to vector<8x256xf32>
    %180 = vector.shape_cast %177 : vector<8x256xf32> to vector<1x1x1x8x256xf32>
    tpu.vector_store %arg3[%c0_102, %c1_103, %c0_104, %c0_105, %c0_106], %180 {strides = array<i32>} : memref<1x2x2x8x256xf32, #tpu.memory_space<vmem>>, vector<1x1x1x8x256xf32>,
    %c0_107 = arith.constant 0 : index
    %c1_108 = arith.constant 1 : index
    %c1_109 = arith.constant 1 : index
    %c0_110 = arith.constant 0 : index
    %c0_111 = arith.constant 0 : index
    %181 = vector.load %arg3[%c0_107, %c1_108, %c1_109, %c0_110, %c0_111] : memref<1x2x2x8x256xf32, #tpu.memory_space<vmem>>, vector<1x1x1x8x256xf32>
    %182 = vector.shape_cast %181 : vector<1x1x1x8x256xf32> to vector<8x256xf32>
    %183 = vector.broadcast %122 : vector<8x1xf32> to vector<8x256xf32>
    %184 = arith.subf %182, %183 : vector<8x256xf32>
    %185 = vector.broadcast %129 : vector<8x1xf32> to vector<8x256xf32>
    %186 = arith.mulf %184, %185 : vector<8x256xf32>
    %cst_112 = arith.constant 5.000000e-01 : f32
    %187 = vector.broadcast %cst_112 : f32 to vector<8x256xf32>
    %188 = arith.mulf %187, %186 : vector<8x256xf32>
    %cst_113 = arith.constant 0.707106769 : f32
    %189 = vector.broadcast %cst_113 : f32 to vector<8x256xf32>
    %190 = arith.mulf %186, %189 : vector<8x256xf32>
    %191 = math.erf %190 : vector<8x256xf32>
    %cst_114 = arith.constant 1.000000e+00 : f32
    %192 = vector.broadcast %cst_114 : f32 to vector<8x256xf32>
    %193 = arith.addf %192, %191 : vector<8x256xf32>
    %194 = arith.mulf %188, %193 : vector<8x256xf32>
    %c0_115 = arith.constant 0 : index
    %c1_116 = arith.constant 1 : index
    %c1_117 = arith.constant 1 : index
    %c0_118 = arith.constant 0 : index
    %c0_119 = arith.constant 0 : index
    %195 = vector.load %arg3[%c0_115, %c1_116, %c1_117, %c0_118, %c0_119] : memref<1x2x2x8x256xf32, #tpu.memory_space<vmem>>, vector<1x1x1x8x256xf32>
    %196 = vector.shape_cast %195 : vector<1x1x1x8x256xf32> to vector<8x256xf32>
    %197 = vector.shape_cast %194 : vector<8x256xf32> to vector<1x1x1x8x256xf32>
    tpu.vector_store %arg3[%c0_115, %c1_116, %c1_117, %c0_118, %c0_119], %197 {strides = array<i32>} : memref<1x2x2x8x256xf32, #tpu.memory_space<vmem>>, vector<1x1x1x8x256xf32>,
    return
  }
  func.func @transform_0(%arg0: i32) -> (i32, i32, i32) {
    %c0_i32 = arith.constant 0 : i32
    %c0_i32_0 = arith.constant 0 : i32
    %c0_i32_1 = arith.constant 0 : i32
    return %arg0, %c0_i32, %c0_i32_0 : i32, i32, i32
  }
  func.func @transform_1(%arg0: i32) -> (i32, i32, i32, i32) {
    %c0_i32 = arith.constant 0 : i32
    %c0_i32_0 = arith.constant 0 : i32
    %c0_i32_1 = arith.constant 0 : i32
    %c0_i32_2 = arith.constant 0 : i32
    %c0_i32_3 = arith.constant 0 : i32
    return %c0_i32, %c0_i32_0, %c0_i32_1, %c0_i32_2 : i32, i32, i32, i32
  }
  func.func @transform_2(%arg0: i32) -> (i32, i32, i32, i32, i32) {
    %c0_i32 = arith.constant 0 : i32
    %c0_i32_0 = arith.constant 0 : i32
    %c0_i32_1 = arith.constant 0 : i32
    %c0_i32_2 = arith.constant 0 : i32
    %c0_i32_3 = arith.constant 0 : i32
    return %arg0, %c0_i32, %c0_i32_0, %c0_i32_1, %c0_i32_2 : i32, i32, i32, i32, i32
  }
}

</mosaic_0001>

<bundles_post_ra>
// kernel: tpu_custom_call.1
= control target key start
LH: loop header
LB: loop body
LE: loop exit
PB: predicated region body
PF: predicated region fallthrough
CT: control target
= control target key end

     0   :  { %7 = vsyncpa [#allocation3], 0  ;;  %s1986_s0 = inlined_call_operand.hbm [shape: f32[2,4,256], index: 0, kind: input, shape index: {}]   ;;  %s1987_s1 = inlined_call_operand.hbm [shape: f32[2,2,8,36], index: 1, kind: input, shape index: {}]   ;;  %s1988_s2 = inlined_call_operand.hbm [shape: f32[2,2,2,8,256], index: 2, kind: output, shape index: {}]  }
   0x1   :  { %9 = vsyncpa [#allocation3 + $0x1], 0 }
   0x2   :  { %10 = vsyncpa [#allocation6], 0 }
   0x3   :  { %11 = vsyncpa [#allocation4], 0 }
   0x4   :  { %13 = vsyncpa [#allocation4 + $0x1], 0  ;;  %s1439_s9 = smov 0   ;;  %s1441_s10 = smov 0  }
   0x5   :  { %s1443_s11 = smov 0   ;;  %s1445_s12 = smov 0  }
   0x6 LB: > { %s108_s15 = sshll.u32 %s1987_s1, 4  ;;  %s1463_s16 = sadd.s32 4294967295, %s1408_s12   ;;  %s1408_s12 = sphi %s1445_s12, %s2012_s12   ;;  %s1404_s11 = sphi %s1443_s11, %s2011_s11   ;;  %s1400_s10 = sphi %s1441_s10, %s2010_s10   ;;  %s1396_s9 = sphi %s1439_s9, %s2009_s9   ;;  %s109_s15 = int_to_ptr.hbm [resolvable:$true] %s108_s15 }
   0x7   : > { %p1096_p0 = scmp.ge.s32.totalorder %s1408_s12, 1  ;;  %p40_p1 = scmp.eq.s32.totalorder %s1463_s16, 0 }
   0x8   : > { %p97_p2 = scmp.lt.s32.totalorder %s1408_s12, 3  ;;  %s1410_s18 = smov [#allocation5]  }
   0x9   : > { %s110_s19 = sshll.u32 %s1410_s18, 4  ;;  %s1411_s20 = smov 128   ;;  %s111_s19 = int_to_ptr.vmem [resolvable:$true] %s110_s19 }
   0xa   : > { %p1468_p3 = pnand %p1096_p0, %p97_p2  ;;  %s1412_s21 = smov 8  }
   0xb   : > { %s1095_s22 = sadd.s32 4294967294, %s1408_s12   ;;  %s1479_s23 = sadd.s32 1, %s1408_s12  }
   0xc   : > { %p1163_p4 = pneg %p1468_p3  ;;  %s26_s24 = sadd.s32 1, %s1404_s11 }
   0xd   : > { %s23_s25 = ssub.s32 %s1408_s12, %s1479_s23  ;;  %p33_p7 = scmp.ne.s32.totalorder %s1404_s11, %s1400_s10 }
   0xe   : > { %p1164_p6 = pnand %p1163_p4, %p40_p1  ;;  %p24_p8 = scmp.eq.s32.totalorder %s23_s25, 0 }
   0xf   : > { %p34_p9 = scmp.eq.s32.totalorder %s1408_s12, 0  ;;  %p39_p10 = scmp.ne.s32.totalorder %s1400_s10, %s1396_s9 }
  0x10   : > { %1166 = dma.hbm_to_vmem [thread:$0]  (!%p1164_p6), %s109_s15, 512, %s111_s19, [#allocation6], %s1411_s20, %s1411_s20, %s1412_s21  }
  0x11   : > { %p84_p11 = scmp.eq.s32.totalorder %s1463_s16, 1  ;;  %p1495_p12 = por %p40_p1, %p39_p10 }
  0x12   : > { %s1491_s26 = scalar_select %p24_p8, %s1404_s11, %s26_s24  }
  0x13   : > { %p1499_p13 = por %p84_p11, %p33_p7  ;;  %p90_p0 = scmp.eq.s32.totalorder %s1095_s22, 1 }
  0x14   : > { %p35_p2 = por %p34_p9, %p33_p7  ;;  %s124_s29 = sand.u32 1, %s1404_s11  }
  0x15   : > { %p1504_p4 = por %p90_p0, %p39_p10  ;;  %p1176_p6 = scmp.lt.s32.totalorder %s1408_s12, 2 }
  0x16   : > { %s1099_s3 = sshll.u32 %s124_s29, 3  ;;  %s1153_s4 = sshll.u32 %s1408_s12, 3 }
  0x17   : > { %s133_s7 = scalar_lea.hbm %s1986_s0, %s1153_s4  ;;  %s128_s13 = scalar_lea.vmem [#allocation2], %s1099_s3 }
  0x18   : > { %s135_s8 = sshll.u32 %s133_s7, 4  ;;  %s137_s14 = sshll.u32 %s128_s13, 4  ;;  %s136_s8 = int_to_ptr.hbm [resolvable:$true] %s135_s8  ;;  %s138_s14 = int_to_ptr.vmem [resolvable:$true] %s137_s14 }
  0x19   : > { %p1513_p8 = pnand %p1176_p6, %p35_p2  ;;  %s125_s18 = scalar_lea.sflag [#allocation3], %s124_s29 }
  0x1a   : > { %s1308_s19 = sshra.s32 %s136_s8, 4  ;;  %s1315_s24 = scalar_lea.hbm %s1986_s0, 16  ;;  %s1309_s19 = int_to_ptr.hbm [resolvable:$true] %s1308_s19 }
  0x1b   : > { %s1310_s20 = scalar_lea.hbm %s1309_s19, 8  ;;  %p1312_p9 = pneg %p1513_p8 }
  0x1c   : > { %p1311_p7 = scmp.ne.s32.totalorder %s1309_s19, %s1310_s20  ;;  %p1316_p0 = scmp.lt.s32.totalorder %s1309_s19, %s1986_s0 }
  0x1d   : > { %p1317_p2 = scmp.lt.s32.totalorder %s1315_s24, %s1310_s20 }
  0x1e   : > { %p1313_p10 = pnand %p1312_p9, %p1311_p7 }
  0x1f   : > { %p1318_p6 = por %p1317_p2, %p1316_p0 }
  0x20   : > { %p1314_p11 = pneg %p1313_p10 }
  0x22   : > { %p1319_p5 = pnand %p1318_p6, %p1314_p11 }
  0x24   : > { %1322 = shalt.err (!%p1319_p5)
}
  0x25   : > { %1170 = dma.hbm_to_vmem [thread:$0]  (!%p1513_p8), %s136_s8, 128, %s138_s14, %s125_s18  }
  0x26   : > { %146 = sbr.rel (%p1468_p3) target bundleno = 739 (0x2e3), region = 28  ;;  %s1530_s29 = sand.u32 (!%p1468_p3), 1, %s1400_s10  }
  0x27   : > { %s1103_s4 = sshll.u32 (!%p1468_p3), %s1530_s29, 3  ;;  %s149_s5 = scalar_lea.sflag (!%p1468_p3), [#allocation3], %s1530_s29 }
  0x28   : > { %s152_s6 = scalar_lea.vmem (!%p1468_p3), [#allocation2], %s1103_s4 }
  0x2b   : > { %1383 = dma.done.wait (%p1495_p12), %s149_s5, 128  }
  0x2c   : > { %1385 = vsyncadd (%p1495_p12), %s149_s5, 4294967168 }
  0x2d   : > { %1387 = dma.done.wait (%p40_p1), [#allocation6], 512  }
  0x2e   : > { %1389 = vsyncadd (%p40_p1), [#allocation6], 4294966784  ;;  %v179_v0 = vld [vmem:[%s152_s6] sm:$0xff]  ;;  %s1413_s17 = smov 17   ;;  %vm188_vm0 = vcmask 138240   ;;  %s1414_s7 = smov 94   ;;  %v195_v15 = vlaneseq }
  0x2f   : > { %181 = vst [vmem:[#allocation1] ss:$2 sm:$0xff] %v179_v0  ;;  %s1415_s27 = smov 110   ;;  %s1416_s8 = smov 112   ;;  %vm296_vm1 = vcmask 769024   ;;  %vm351_vm3 = vcmask 1043456  }
  0x30   : > { %s1417_s13 = smov 96   ;;  %s1418_s14 = smov 126   ;;  %v196_v17 = vand.u32 127, %v195_v15  ;;  %vm270_vm5 = vcmask 900096   ;;  %vm257_vm6 = vcmask 916480   ;;  %vm283_vm7 = vcmask 785408  }
  0x31   : > { %s1419_s15 = smov 111   ;;  %s1420_s18 = smov 95   ;;  %vm329_vm10 = vcmask 908288   ;;  %vm244_vm11 = vcmask 1031168   ;;  %vm346_vm12 = vcmask 777216   ;;  %vm312_vm13 = vcmask 1039360  }
  0x32   : > { %s1421_s19 = smov 127   ;;  %v197_v19 = vadd.s32 128, %v196_v17  ;;  %v202_v23 = vand.u32 15, %v196_v17  ;;  %vm361_vm14 = vcmask 293888   ;;  %s1105_s20 = sshll.u32 %s1530_s29, 6 }
  0x33   : > { %s1886_s21 = scalar_lea.vmem [#allocation7], %s1105_s20  ;;  %s1154_s22 = sshll.u32 %s1463_s16, 6 }
  0x34   : > { %v209_v20 = vand.u32 15, %v197_v19  ;;  %vm1556_vm4 = vcmp.lt.s32.totalorder %v202_v23, 15  ;;  %vm1578_vm8 = vcmp.ge.s32.totalorder %v202_v23, 1  ;;  %s1008_s3 = scalar_lea.hbm %s1988_s2, %s1154_s22  ;;  %s1009_s16 = sshll.u32 %s1886_s21, 4  ;;  %s1010_s16 = int_to_ptr.vmem [resolvable:$true] %s1009_s16 }
  0x35   : > { %s1011_s4 = sshll.u32 %s1008_s3, 4  ;;  %s997_s5 = scalar_lea.sflag [#allocation4], %s1530_s29  ;;  %s1012_s4 = int_to_ptr.hbm [resolvable:$true] %s1011_s4 }
  0x36   : > { %v182_v1 = vld.sshfl [vmem:[#allocation1] sm:$0xff pattern:$0x75316420]  ;;  %v183_v2 = vld.sshfl [vmem:[#allocation1 + $0x8] sm:$0xff pattern:$0x75316420] }
  0x37   : > { %184 = vrot.lane.b32.xlu0 %v182_v1, %s1413_s17  ;;  %vm1552_vm2 = vcmp.lt.s32.totalorder %v209_v20, 15  ;;  %vm1584_vm9 = vcmp.ge.s32.totalorder %v209_v20, 1  ;;  %s1352_s6 = sshra.s32 %s1012_s4, 4  ;;  %s1353_s6 = int_to_ptr.hbm [resolvable:$true] %s1352_s6 }
  0x38   : > { %p1359_p12 = scmp.lt.s32.totalorder %s1353_s6, %s1988_s2 }
  0x3f   : > { %186 = vrot.lane.b32.xlu0 %v183_v2, %s1413_s17  ;;  %s1354_s17 = scalar_lea.hbm %s1353_s6, 64 }
  0x40   : > { %p1355_p1 = scmp.ne.s32.totalorder %s1353_s6, %s1354_s17 }
  0x42   : > { %p1356_p3 = pnand %p1355_p1, %p1499_p13 }
  0x44   : > { %p1357_p5 = pneg %p1356_p3 }
  0xa9   : > { %v185_v3 = vpop.permute.xlu0 %184 }
  0xaa   : > { %v1542_v4 = vsel %vm188_vm0, 0.0, %v185_v3 }
  0xab   : > { %290 = vrot.lane.b32.xlu1 %v1542_v4, %s1414_s7  ;;  %v303_v10 = vrot.slane %v1542_v4, 4  ;;  %v228_v23 = vsel %vm1578_vm8, %v1542_v4, 0.0 }
  0xb1   : > { %v187_v5 = vpop.permute.xlu0 %186 }
  0xb2   : > { %v1545_v6 = vsel %vm188_vm0, %v185_v3, %v187_v5  ;;  %v194_v7 = vsel %vm188_vm0, %v187_v5, 0.0 }
  0xb3   : > { %268 = vrot.lane.b32.xlu0 %v194_v7, %s1415_s27  ;;  %294 = vrot.lane.b32.xlu2 %v194_v7, %s1414_s7  ;;  %v1225_v8 = vpack.i.bf16 %v1545_v6, %v1542_v4  ;;  %v304_v9 = vrot.slane %v1545_v6, 4  ;;  %v305_v12 = vrot.slane %v194_v7, 4  ;;  %v229_v4 = vsel %vm1584_vm9, %v1545_v6, 0.0 }
  0xb4   : > { %292 = vrot.lane.b32.xlu1 %v1545_v6, %s1414_s7  ;;  %v540_v6 = vld [vmem:[#allocation5 + $0x18] sm:$0xff] }
  0xb5   : > { %v1250_v11 = vpack.i.bf16 %v304_v9, %v303_v10 }
  0xbb   : > { %255 = vrot.lane.b32.xlu0 %v194_v7, %s1416_s8  ;;  %1226 = vrot.lane.b32.xlu2 %v1225_v8, %s1415_s27 }
  0xbc   : > { %1231 = vrot.lane.b32.xlu1 %v1225_v8, %s1417_s13 }
  0xc3   : > { %1246 = vrot.lane.b32.xlu0 %v1225_v8, %s1418_s14  ;;  %281 = vrot.lane.b32.xlu2 %v194_v7, %s1417_s13 }
  0xc4   : > { %1241 = vrot.lane.b32.xlu1 %v1225_v8, %s1419_s15 }
  0xcb   : > { %1236 = vrot.lane.b32.xlu2 %v1225_v8, %s1416_s8  ;;  %1251 = vrot.lane.b32.xlu0 %v1250_v11, %s1420_s18  ;;  %s1358_s8 = scalar_lea.hbm %s1988_s2, 128 }
  0xcc   : > { %344 = vrot.lane.b32.xlu1 %v305_v12, %s1420_s18  ;;  %p1360_p8 = scmp.lt.s32.totalorder %s1358_s8, %s1354_s17 }
  0xce   : > { %p1361_p7 = por %p1360_p8, %p1359_p12 }
  0xd0   : > { %p1362_p9 = pnand %p1361_p7, %p1357_p5 }
  0xd3   : > { %327 = vrot.lane.b32.xlu2 %v194_v7, %s1419_s15  ;;  %310 = vrot.lane.b32.xlu0 %v305_v12, %s1421_s19 }
  0xd4   : > { %242 = vrot.lane.b32.xlu1 %v194_v7, %s1418_s14 }
  0xdb   : > { %1256 = vrot.lane.b32.xlu2 %v1250_v11, %s1421_s19 }
 0x10d   : > { %v295_v13 = vpop.permute.xlu2 %294 }
 0x115   : > { %v1227_v14 = vpop.permute.xlu2 %1226 }
 0x116   : > { %v1229_v33 = vunpack.i.h.bf16 %v1227_v14  ;;  %v1228_v34 = vunpack.i.l.bf16 %v1227_v14 }
 0x118   : > { %v271_v37 = vsel %vm270_vm5, %v1228_v34, %v1229_v33 }
 0x119   : > { %v275_v45 = vsel %vm1556_vm4, %v271_v37, 0.0 }
 0x11a   : > { %v336_v56 = vrot.slane %v275_v45, 4 }
 0x11d   : > { %v291_v16 = vpop.permute.xlu1 %290  ;;  %v282_v18 = vpop.permute.xlu2 %281 }
 0x125   : > { %v269_v22 = vpop.permute.xlu0 %268  ;;  %v1237_v28 = vpop.permute.xlu2 %1236 }
 0x126   : > { %v293_v24 = vpop.permute.xlu1 %292  ;;  %v1239_v39 = vunpack.i.h.bf16 %v1237_v28  ;;  %v1238_v40 = vunpack.i.l.bf16 %v1237_v28  ;;  %v272_v44 = vsel %vm270_vm5, %v1229_v33, %v269_v22  ;;  %v360_v33 = vld [vmem:[#allocation5] sm:$0xff] }
 0x127   : > { %v297_v26 = vsel %vm296_vm1, %v291_v16, %v293_v24  ;;  %v298_v27 = vsel %vm296_vm1, %v293_v24, %v295_v13  ;;  %v276_v55 = vsel %vm1552_vm2, %v272_v44, 0.0 }
 0x128   : > { %v1562_v29 = vsel %vm1556_vm4, %v297_v26, 0.0  ;;  %v1566_v30 = vsel %vm1552_vm2, %v298_v27, 0.0  ;;  %v258_v47 = vsel %vm257_vm6, %v1238_v40, %v1239_v39  ;;  %v337_v9 = vrot.slane %v276_v55, 4 }
 0x129   : > { %1106 = vmatpush.msk.msra.mxu0 %vm351_vm3, %v1562_v29  ;;  %1108 = vmatpush.msk.msra.mxu1 %vm351_vm3, %v1566_v30  ;;  %v262_v58 = vsel %vm1578_vm8, %v258_v47, 0.0 }
 0x12a   : > { %1110 = vmatpush.msk.msra.mxu2 %vm351_vm3, %v1562_v29  ;;  %1112 = vmatpush.msk.msra.mxu3 %vm351_vm3, %v1566_v30  ;;  %v319_v14 = vrot.slane %v262_v58, 4 }
 0x12d   : > { %v256_v31 = vpop.permute.xlu0 %255  ;;  %v328_v35 = vpop.permute.xlu2 %327 }
 0x12e   : > { %v1232_v32 = vpop.permute.xlu1 %1231  ;;  %v259_v10 = vsel %vm257_vm6, %v1239_v39, %v256_v31 }
 0x12f   : > { %v1234_v41 = vunpack.i.h.bf16 %v1232_v32  ;;  %v1233_v42 = vunpack.i.l.bf16 %v1232_v32  ;;  %v263_v17 = vsel %vm1584_vm9, %v259_v10, 0.0  ;;  %v424_v32 = vld [vmem:[#allocation5 + $0x8] sm:$0xff] }
 0x130   : > { %v320_v24 = vrot.slane %v263_v17, 4 }
 0x131   : > { %v284_v48 = vsel %vm283_vm7, %v1233_v42, %v1234_v41  ;;  %v285_v51 = vsel %vm283_vm7, %v1234_v41, %v282_v18 }
 0x132   : > { %v288_v62 = vsel %vm1578_vm8, %v284_v48, 0.0  ;;  %v289_v1 = vsel %vm1584_vm9, %v285_v51, 0.0 }
 0x135   : > { %v1576_v36 = vpop.permute.xlu0 %1246  ;;  %v1257_v54 = vpop.permute.xlu2 %1256 }
 0x136   : > { %v1242_v38 = vpop.permute.xlu1 %1241  ;;  %v1249_v49 = vunpack.i.h.bf16 %v1576_v36  ;;  %v1248_v50 = vunpack.i.l.bf16 %v1576_v36  ;;  %v1259_v63 = vunpack.i.h.bf16 %v1257_v54  ;;  %v1258_v0 = vunpack.i.l.bf16 %v1257_v54 }
 0x137   : > { %v1244_v52 = vunpack.i.h.bf16 %v1242_v38  ;;  %v1243_v53 = vunpack.i.l.bf16 %v1242_v38 }
 0x138   : > { %v245_v2 = vsel %vm244_vm11, %v1248_v50, %v1249_v49  ;;  %v313_v18 = vsel %vm312_vm13, %v1258_v0, %v1259_v63 }
 0x139   : > { %v330_v7 = vsel %vm329_vm10, %v1243_v53, %v1244_v52  ;;  %v331_v8 = vsel %vm329_vm10, %v1244_v52, %v328_v35  ;;  %v249_v13 = vsel %vm1556_vm4, %v245_v2, 0.0  ;;  %v352_v26 = vsel %vm351_vm3, %v228_v23, %v313_v18 }
 0x13a   : > { %v356_v15 = vsel %vm351_vm3, %v330_v7, %v336_v56  ;;  %v357_v16 = vsel %vm351_vm3, %v331_v8, %v337_v9  ;;  %v354_v20 = vsel %vm351_vm3, %v249_v13, %v319_v14 }
 0x13d   : > { %v1252_v57 = vpop.permute.xlu0 %1251 }
 0x13e   : > { %v345_v59 = vpop.permute.xlu1 %344  ;;  %v1254_v60 = vunpack.i.h.bf16 %v1252_v57  ;;  %v1253_v61 = vunpack.i.l.bf16 %v1252_v57 }
 0x140   : > { %v347_v3 = vsel %vm346_vm12, %v1253_v61, %v1254_v60  ;;  %v348_v5 = vsel %vm346_vm12, %v1254_v60, %v345_v59 }
 0x141   : > { %v358_v11 = vsel %vm351_vm3, %v288_v62, %v347_v3  ;;  %v359_v12 = vsel %vm351_vm3, %v289_v1, %v348_v5 }
 0x142   : > { %383 = vmatpush.msra.mxu0 %v358_v11  ;;  %403 = vmatpush.msra.mxu1 %v359_v12 }
 0x143   : > { %440 = vmatpush.msra.mxu2 %v358_v11  ;;  %460 = vmatpush.msra.mxu3 %v359_v12 }
 0x144   : > { %384 = vmatpush.msra.mxu0 %v356_v15  ;;  %404 = vmatpush.msra.mxu1 %v357_v16 }
 0x145   : > { %441 = vmatpush.msra.mxu2 %v356_v15  ;;  %461 = vmatpush.msra.mxu3 %v357_v16  ;;  %v311_v19 = vpop.permute.xlu0 %310 }
 0x146   : > { %v243_v22 = vpop.permute.xlu1 %242  ;;  %385 = vmatpush.msra.mxu0 %v354_v20  ;;  %v314_v28 = vsel %vm312_vm13, %v1259_v63, %v311_v19 }
 0x147   : > { %v246_v25 = vsel %vm244_vm11, %v1249_v49, %v243_v22  ;;  %442 = vmatpush.msra.mxu2 %v354_v20  ;;  %v353_v21 = vsel %vm351_vm3, %v229_v4, %v314_v28 }
 0x148   : > { %v250_v27 = vsel %vm1552_vm2, %v246_v25, 0.0  ;;  %386 = vmatpush.msra.mxu0 %v352_v26 }
 0x149   : > { %443 = vmatpush.msra.mxu2 %v352_v26  ;;  %v355_v31 = vsel %vm351_vm3, %v250_v27, %v320_v24  ;;  %1107 = vmatmul.msk.f32.vlgmr.msra.gmra.mxu0 %vm361_vm14, %v360_v33 }
 0x14a   : > { %1116 = vmatpush.msk.msrb.mxu0 %vm351_vm3, %v1562_v29  ;;  %405 = vmatpush.msra.mxu1 %v355_v31 }
 0x14b   : > { %462 = vmatpush.msra.mxu3 %v355_v31  ;;  %1122 = vmatpush.msk.msrb.mxu2 %vm351_vm3, %v1562_v29  ;;  %v482_v29 = vld [vmem:[#allocation5 + $0x10] sm:$0xff] }
 0x14c   : > { %498 = vmatpush.msrb.mxu0 %v358_v11  ;;  %406 = vmatpush.msra.mxu1 %v353_v21 }
 0x14d   : > { %463 = vmatpush.msra.mxu3 %v353_v21  ;;  %556 = vmatpush.msrb.mxu2 %v358_v11 }
 0x14e   : > { %1113 = vmatmul.msk.f32.vlgmr.msra.gmra.mxu3 %vm361_vm14, %v424_v32  ;;  %1111 = vmatmul.msk.f32.vlgmr.msra.gmra.mxu2 %vm361_vm14, %v424_v32 }
 0x14f   : > { %1118 = vmatpush.msk.msrb.mxu1 %vm351_vm3, %v1566_v30  ;;  %1124 = vmatpush.msk.msrb.mxu3 %vm351_vm3, %v1566_v30 }
 0x150   : > { %1109 = vmatmul.msk.f32.vlgmr.msra.gmra.mxu1 %vm361_vm14, %v360_v33  ;;  %499 = vmatpush.msrb.mxu0 %v356_v15 }
 0x151   : > { %557 = vmatpush.msrb.mxu2 %v356_v15  ;;  %518 = vmatpush.msrb.mxu1 %v359_v12 }
 0x152   : > { %576 = vmatpush.msrb.mxu3 %v359_v12  ;;  %500 = vmatpush.msrb.mxu0 %v354_v20 }
 0x153   : > { %558 = vmatpush.msrb.mxu2 %v354_v20  ;;  %519 = vmatpush.msrb.mxu1 %v357_v16 }
 0x154   : > { %577 = vmatpush.msrb.mxu3 %v357_v16  ;;  %501 = vmatpush.msrb.mxu0 %v352_v26 }
 0x155   : > { %559 = vmatpush.msrb.mxu2 %v352_v26  ;;  %520 = vmatpush.msrb.mxu1 %v355_v31 }
 0x156   : > { %578 = vmatpush.msrb.mxu3 %v355_v31  ;;  %1123 = vmatmul.msk.f32.vlgmr.msrb.gmra.mxu2 %vm361_vm14, %v540_v6 }
 0x157   : > { %521 = vmatpush.msrb.mxu1 %v353_v21  ;;  %1117 = vmatmul.msk.f32.vlgmr.msrb.gmra.mxu0 %vm361_vm14, %v482_v29 }
 0x158   : > { %579 = vmatpush.msrb.mxu3 %v353_v21  ;;  %1119 = vmatmul.msk.f32.vlgmr.msrb.gmra.mxu1 %vm361_vm14, %v482_v29 }
 0x159   : > { %1125 = vmatmul.msk.f32.vlgmr.msrb.gmra.mxu3 %vm361_vm14, %v540_v6 }
 0x1c6   : > { %v1642_v30 = vpop.f32.mrf.mxu0 }
 0x1c7   : > { %v415_v35 = vmul.f32 %v1642_v30, %v1642_v30 }
 0x1cd   : > { %v1644_v34 = vpop.f32.mrf.mxu1 }
 0x1ce   : > { %v411_v36 = vadd.f32 %v1644_v34, %v1642_v30  ;;  %v416_v37 = vmul.f32 %v1644_v34, %v1644_v34 }
 0x1d0   : > { %412 = vadd.xlane.f32.xlu1 %v411_v36  ;;  %v417_v39 = vadd.f32 %v416_v37, %v415_v35 }
 0x1d1   : > { %v1652_v38 = vpop.f32.mrf.mxu3  ;;  %v445_v40 = vpop.f32.mrf.mxu2 }
 0x1d2   : > { %v468_v41 = vadd.f32 %v1652_v38, %v445_v40  ;;  %418 = vadd.xlane.f32.xlu0 %v417_v39  ;;  %v472_v45 = vmul.f32 %v445_v40, %v445_v40  ;;  %v473_v46 = vmul.f32 %v1652_v38, %v1652_v38 }
 0x1d4   : > { %v1655_v42 = vpop.f32.mrf.mxu0  ;;  %469 = vadd.xlane.f32.xlu2 %v468_v41  ;;  %v474_v48 = vadd.f32 %v473_v46, %v472_v45 }
 0x1d5   : > { %v1657_v43 = vpop.f32.mrf.mxu1  ;;  %v530_v53 = vmul.f32 %v1655_v42, %v1655_v42 }
 0x1d6   : > { %v526_v44 = vadd.f32 %v1657_v43, %v1655_v42  ;;  %v531_v54 = vmul.f32 %v1657_v43, %v1657_v43 }
 0x1d8   : > { %527 = vadd.xlane.f32.xlu1 %v526_v44  ;;  %v532_v56 = vadd.f32 %v531_v54, %v530_v53 }
 0x1d9   : > { %v1663_v47 = vpop.f32.mrf.mxu2 }
 0x1da   : > { %v588_v49 = vmul.f32 %v1663_v47, %v1663_v47 }
 0x1dc   : > { %v1667_v50 = vpop.f32.mrf.mxu3  ;;  %475 = vadd.xlane.f32.xlu2 %v474_v48 }
 0x1dd   : > { %v589_v51 = vmul.f32 %v1667_v50, %v1667_v50  ;;  %v584_v52 = vadd.f32 %v1667_v50, %v1663_v47 }
 0x1df   : > { %585 = vadd.xlane.f32.xlu0 %v584_v52  ;;  %v590_v55 = vadd.f32 %v589_v51, %v588_v49 }
 0x1e1   : > { %591 = vadd.xlane.f32.xlu1 %v590_v55 }
 0x1e4   : > { %533 = vadd.xlane.f32.xlu2 %v532_v56 }
 0x243   : > { %v413_v57 = vpop.xlane.xlu1 %412 }
 0x245   : > { %v419_v59 = vpop.xlane.xlu0 %418 }
 0x247   : > { %v470_v58 = vpop.xlane.xlu2 %469 }
 0x248   : > { %v471_v60 = vadd.f32 %v470_v58, %v413_v57 }
 0x24b   : > { %v528_v61 = vpop.xlane.xlu1 %527 }
 0x24c   : > { %v529_v63 = vadd.f32 %v528_v61, %v471_v60 }
 0x24f   : > { %v476_v62 = vpop.xlane.xlu2 %475 }
 0x250   : > { %v477_v2 = vadd.f32 %v476_v62, %v419_v59 }
 0x252   : > { %v586_v0 = vpop.xlane.xlu0 %585 }
 0x253   : > { %v587_v1 = vadd.f32 %v586_v0, %v529_v63 }
 0x254   : > { %v592_v5 = vpop.xlane.xlu1 %591 }
 0x255   : > { %v1677_v7 = vmul.f32 0.0009765625, %v587_v1 }
 0x257   : > { %v534_v3 = vpop.xlane.xlu2 %533  ;;  %v599_v10 = vmul.f32 %v1677_v7, %v1677_v7  ;;  %v614_v20 = vsub.f32 %v1642_v30, %v1677_v7  ;;  %v615_v22 = vsub.f32 %v1644_v34, %v1677_v7  ;;  %v710_v23 = vsub.f32 %v445_v40, %v1677_v7 }
 0x258   : > { %v535_v8 = vadd.f32 %v534_v3, %v477_v2  ;;  %v711_v24 = vsub.f32 %v1652_v38, %v1677_v7  ;;  %v806_v48 = vsub.f32 %v1655_v42, %v1677_v7  ;;  %v807_v53 = vsub.f32 %v1657_v43, %v1677_v7 }
 0x25a   : > { %v593_v9 = vadd.f32 %v592_v5, %v535_v8 }
 0x25c   : > { %v598_v11 = vmul.f32 0.0009765625, %v593_v9 }
 0x25e   : > { %v600_v12 = vsub.f32 %v598_v11, %v599_v10 }
 0x260   : > { %v601_v13 = vadd.f32 1e-05, %v600_v12 }
 0x262   : > { %1260 = vrsqrt.f32 %v601_v13  ;;  %vm608_vm0 = vweird.f32 %v601_v13 }
 0x268   : > { %v1261_v14 = vpop.eup %1260 }
 0x269   : > { %v603_v15 = vmul.f32 %v1261_v14, %v601_v13  ;;  %vm609_vm15 = vweird.f32 %v1261_v14 }
 0x26a   : > { %vm610_vm1 = vmor %vm608_vm0, %vm609_vm15 }
 0x26b   : > { %v604_v16 = vmul.f32 %v1261_v14, %v603_v15 }
 0x26d   : > { %v605_v17 = vmul.f32 0.5, %v604_v16 }
 0x26f   : > { %v606_v18 = vsub.f32 1.5, %v605_v17 }
 0x271   : > { %v607_v19 = vmul.f32 %v1261_v14, %v606_v18 }
 0x273   : > { %v1688_v25 = vsel %vm610_vm1, %v1261_v14, %v607_v19 }
 0x274   : > { %v1691_v26 = vmul.f32 %v614_v20, %v1688_v25  ;;  %v1694_v27 = vmul.f32 %v615_v22, %v1688_v25  ;;  %v1697_v28 = vmul.f32 %v710_v23, %v1688_v25  ;;  %v1700_v31 = vmul.f32 %v711_v24, %v1688_v25 }
 0x275   : > { %v1749_v2 = vmul.f32 %v806_v48, %v1688_v25  ;;  %v1752_v9 = vmul.f32 %v807_v53, %v1688_v25 }
 0x276   : > { %v1703_v4 = vmul.f32 0.70710677, %v1691_v26  ;;  %v1706_v32 = vmul.f32 0.70710677, %v1694_v27  ;;  %v1709_v21 = vmul.f32 0.70710677, %v1697_v28 }
 0x277   : > { %v1712_v33 = vmul.f32 0.70710677, %v1700_v31 }
 0x278   : > { %v622_v6 = vmul.f32 %v1703_v4, %v1703_v4  ;;  %v662_v29 = vmul.f32 %v1706_v32, %v1706_v32  ;;  %v718_v30 = vmul.f32 %v1709_v21, %v1709_v21 }
 0x279   : > { %v758_v34 = vmul.f32 %v1712_v33, %v1712_v33 }
 0x27a   : > { %v1722_v35 = vmin.f32 %v622_v6, 16.0  ;;  %v1724_v36 = vmin.f32 %v662_v29, 16.0  ;;  %v1726_v37 = vmin.f32 %v718_v30, 16.0 }
 0x27b   : > { %v1728_v38 = vmin.f32 %v758_v34, 16.0 }
 0x27c   : > { %v624_v39 = vmul.f32 2.1237322e-06, %v1722_v35  ;;  %v635_v40 = vmul.f32 3.8918573e-05, %v1722_v35  ;;  %v664_v41 = vmul.f32 2.1237322e-06, %v1724_v36 }
 0x27d   : > { %v675_v44 = vmul.f32 3.8918573e-05, %v1724_v36  ;;  %v720_v45 = vmul.f32 2.1237322e-06, %v1726_v37  ;;  %v731_v46 = vmul.f32 3.8918573e-05, %v1726_v37 }
 0x27e   : > { %v625_v49 = vadd.f32 0.00028619796, %v624_v39  ;;  %v636_v51 = vadd.f32 0.001143296, %v635_v40  ;;  %v665_v52 = vadd.f32 0.00028619796, %v664_v41 }
 0x27f   : > { %v676_v54 = vadd.f32 0.001143296, %v675_v44  ;;  %v721_v55 = vadd.f32 0.00028619796, %v720_v45  ;;  %v732_v56 = vadd.f32 0.001143296, %v731_v46 }
 0x280   : > { %v626_v57 = vmul.f32 %v625_v49, %v1722_v35  ;;  %v637_v58 = vmul.f32 %v636_v51, %v1722_v35  ;;  %v666_v59 = vmul.f32 %v665_v52, %v1724_v36  ;;  %v760_v60 = vmul.f32 2.1237322e-06, %v1728_v38 }
 0x281   : > { %v677_v61 = vmul.f32 %v676_v54, %v1724_v36  ;;  %v722_v42 = vmul.f32 %v721_v55, %v1726_v37  ;;  %v733_v62 = vmul.f32 %v732_v56, %v1726_v37  ;;  %v771_v63 = vmul.f32 3.8918573e-05, %v1728_v38 }
 0x282   : > { %v627_v43 = vadd.f32 0.0036580483, %v626_v57  ;;  %v638_v0 = vadd.f32 0.014752088, %v637_v58  ;;  %v667_v1 = vadd.f32 0.0036580483, %v666_v59 }
 0x283   : > { %v678_v3 = vadd.f32 0.014752088, %v677_v61  ;;  %v723_v5 = vadd.f32 0.0036580483, %v722_v42  ;;  %v734_v8 = vadd.f32 0.014752088, %v733_v62 }
 0x284   : > { %v628_v10 = vmul.f32 %v627_v43, %v1722_v35  ;;  %v639_v11 = vmul.f32 %v638_v0, %v1722_v35  ;;  %v668_v12 = vmul.f32 %v667_v1, %v1724_v36  ;;  %v761_v13 = vadd.f32 0.00028619796, %v760_v60 }
 0x285   : > { %v679_v14 = vmul.f32 %v678_v3, %v1724_v36  ;;  %v724_v15 = vmul.f32 %v723_v5, %v1726_v37  ;;  %v735_v16 = vmul.f32 %v734_v8, %v1726_v37  ;;  %v772_v17 = vadd.f32 0.001143296, %v771_v63 }
 0x286   : > { %v629_v18 = vadd.f32 0.05243302, %v628_v10  ;;  %v640_v19 = vadd.f32 0.112945676, %v639_v11  ;;  %v669_v20 = vadd.f32 0.05243302, %v668_v12  ;;  %v762_v22 = vmul.f32 %v761_v13, %v1728_v38 }
 0x287   : > { %v680_v23 = vadd.f32 0.112945676, %v679_v14  ;;  %v725_v24 = vadd.f32 0.05243302, %v724_v15  ;;  %v736_v6 = vadd.f32 0.112945676, %v735_v16  ;;  %v773_v29 = vmul.f32 %v772_v17, %v1728_v38 }
 0x288   : > { %v630_v30 = vmul.f32 %v629_v18, %v1722_v35  ;;  %v641_v34 = vmul.f32 %v640_v19, %v1722_v35  ;;  %v670_v39 = vmul.f32 %v669_v20, %v1724_v36  ;;  %v763_v40 = vadd.f32 0.0036580483, %v762_v22 }
 0x289   : > { %v681_v41 = vmul.f32 %v680_v23, %v1724_v36  ;;  %v726_v44 = vmul.f32 %v725_v24, %v1726_v37  ;;  %v737_v45 = vmul.f32 %v736_v6, %v1726_v37  ;;  %v774_v46 = vadd.f32 0.014752088, %v773_v29 }
 0x28a   : > { %v631_v48 = vadd.f32 0.18741608, %v630_v30  ;;  %v642_v49 = vadd.f32 0.4994258, %v641_v34  ;;  %v671_v51 = vadd.f32 0.18741608, %v670_v39  ;;  %v764_v52 = vmul.f32 %v763_v40, %v1728_v38 }
 0x28b   : > { %v682_v53 = vadd.f32 0.4994258, %v681_v41  ;;  %v727_v54 = vadd.f32 0.18741608, %v726_v44  ;;  %v738_v55 = vadd.f32 0.4994258, %v737_v45  ;;  %v775_v56 = vmul.f32 %v774_v46, %v1728_v38 }
 0x28c   : > { %v632_v57 = vmul.f32 %v631_v48, %v1722_v35  ;;  %v643_v58 = vmul.f32 %v642_v49, %v1722_v35  ;;  %v1773_v59 = vmul.f32 0.70710677, %v1749_v2  ;;  %v672_v60 = vmul.f32 %v671_v51, %v1724_v36 }
 0x28d   : > { %v683_v61 = vmul.f32 %v682_v53, %v1724_v36  ;;  %v739_v42 = vmul.f32 %v738_v55, %v1726_v37  ;;  %v776_v62 = vadd.f32 0.112945676, %v775_v56  ;;  %v728_v43 = vmul.f32 %v727_v54, %v1726_v37 }
 0x28e   : > { %v1778_v63 = vadd.f32 1.0, %v643_v58  ;;  %v765_v0 = vadd.f32 0.05243302, %v764_v52  ;;  %v902_v1 = vsub.f32 %v1663_v47, %v1677_v7  ;;  %v1788_v5 = vmul.f32 0.70710677, %v1752_v9 }
 0x28f   : > { %v1783_v3 = vadd.f32 1.0, %v683_v61  ;;  %v1785_v35 = vadd.f32 1.0, %v739_v42  ;;  %v903_v36 = vsub.f32 %v1667_v50, %v1677_v7  ;;  %v1793_v8 = vmul.f32 0.5, %v1691_v26 }
 0x290   : > { %v633_v10 = vadd.f32 1.1283791, %v632_v57  ;;  %1262 = vrcp.f32 %v1778_v63  ;;  %v673_v37 = vadd.f32 1.1283791, %v672_v60  ;;  %v777_v47 = vmul.f32 %v776_v62, %v1728_v38 }
 0x291   : > { %1264 = vrcp.f32 %v1783_v3  ;;  %v814_v11 = vmul.f32 %v1773_v59, %v1773_v59  ;;  %v1801_v12 = vmul.f32 0.5, %v1694_v27  ;;  %v656_v13 = vand.u32 2147483648, %v1778_v63 }
 0x292   : > { %v729_v50 = vadd.f32 1.1283791, %v728_v43  ;;  %v766_v7 = vmul.f32 %v765_v0, %v1728_v38  ;;  %v654_v26 = vand.u32 2147483647, %v1778_v63  ;;  %v1807_v14 = vmul.f32 0.5, %v1697_v28 }
 0x293   : > { %1266 = vrcp.f32 %v1785_v35  ;;  %v854_v15 = vmul.f32 %v1788_v5, %v1788_v5  ;;  %v634_v16 = vmul.f32 %v633_v10, %v1703_v4  ;;  %v694_v27 = vand.u32 2147483647, %v1783_v3 }
 0x294   : > { %v1815_v17 = vmul.f32 %v902_v1, %v1688_v25  ;;  %v1818_v18 = vmul.f32 %v903_v36, %v1688_v25  ;;  %vm650_vm2 = vweird.f32 %v1778_v63  ;;  %v674_v28 = vmul.f32 %v673_v37, %v1706_v32 }
 0x295   : > { %v778_v19 = vadd.f32 0.4994258, %v777_v47  ;;  %v1822_v20 = vmin.f32 %v814_v11, 16.0  ;;  %v657_v23 = vor.u32 1.1754944e-38, %v656_v13  ;;  %vm690_vm3 = vweird.f32 %v1783_v3 }
 0x296   : > { %v1263_v22 = vpop.eup %1262  ;;  %v696_v4 = vand.u32 2147483648, %v1783_v3  ;;  %v1827_v24 = vmul.f32 %v729_v50, %v1709_v21  ;;  %v767_v6 = vadd.f32 0.18741608, %v766_v7  ;;  %vm1830_vm4 = vcmp.eq.f32.partialorder %v654_v26, 8.507059e+37 }
 0x297   : > { %v1265_v29 = vpop.eup %1264  ;;  %v646_v25 = vmul.f32 %v1263_v22, %v1778_v63  ;;  %v779_v32 = vmul.f32 %v778_v19, %v1728_v38  ;;  %v816_v34 = vmul.f32 2.1237322e-06, %v1822_v20  ;;  %v1836_v39 = vmin.f32 %v854_v15, 16.0 }
 0x298   : > { %v686_v40 = vmul.f32 %v1265_v29, %v1783_v3  ;;  %vm1839_vm5 = vcmp.eq.f32.partialorder %v694_v27, 8.507059e+37  ;;  %vm746_vm6 = vweird.f32 %v1785_v35  ;;  %v750_v21 = vand.u32 2147483647, %v1785_v35 }
 0x299   : > { %v752_v44 = vand.u32 2147483648, %v1785_v35  ;;  %v1267_v45 = vpop.eup %1266  ;;  %v647_v46 = vsub.f32 1.0, %v646_v25  ;;  %v1846_v48 = vadd.f32 1.0, %v779_v32  ;;  %v817_v49 = vadd.f32 0.00028619796, %v816_v34 }
 0x29a   : > { %v827_v51 = vmul.f32 3.8918573e-05, %v1822_v20  ;;  %v687_v52 = vsub.f32 1.0, %v686_v40  ;;  %v697_v53 = vor.u32 1.1754944e-38, %v696_v4  ;;  %v742_v54 = vmul.f32 %v1267_v45, %v1785_v35 }
 0x29b   : > { %v768_v55 = vmul.f32 %v767_v6, %v1728_v38  ;;  %v648_v56 = vmul.f32 %v1263_v22, %v647_v46  ;;  %vm651_vm7 = vweird.f32 %v1263_v22  ;;  %1268 = vrcp.f32 %v1846_v48 }
 0x29c   : > { %v856_v57 = vmul.f32 2.1237322e-06, %v1836_v39  ;;  %v688_v58 = vmul.f32 %v1265_v29, %v687_v52  ;;  %vm691_vm8 = vweird.f32 %v1265_v29  ;;  %v743_v60 = vsub.f32 1.0, %v742_v54  ;;  %vm652_vm10 = vmor %vm650_vm2, %vm651_vm7 }
 0x29d   : > { %v818_v61 = vmul.f32 %v817_v49, %v1822_v20  ;;  %v649_v42 = vadd.f32 %v1263_v22, %v648_v56  ;;  %vm1854_vm9 = vcmp.eq.f32.partialorder %v750_v21, 8.507059e+37  ;;  %v753_v43 = vor.u32 1.1754944e-38, %v752_v44  ;;  %vm692_vm12 = vmor %vm690_vm3, %vm691_vm8 }
 0x29e   : > { %v828_v0 = vadd.f32 0.001143296, %v827_v51  ;;  %v689_v38 = vadd.f32 %v1265_v29, %v688_v58  ;;  %v744_v1 = vmul.f32 %v1267_v45, %v743_v60  ;;  %vm747_vm11 = vweird.f32 %v1267_v45 }
 0x29f   : > { %v769_v36 = vadd.f32 1.1283791, %v768_v55  ;;  %v653_v10 = vsel %vm652_vm10, %v1263_v22, %v649_v42  ;;  %v792_v37 = vand.u32 2147483648, %v1846_v48  ;;  %v857_v11 = vadd.f32 0.00028619796, %v856_v57  ;;  %vm748_vm14 = vmor %vm746_vm6, %vm747_vm11 }
 0x2a0   : > { %v829_v47 = vmul.f32 %v828_v0, %v1822_v20  ;;  %v658_v13 = vsel %vm1830_vm4, %v657_v23, %v653_v10  ;;  %v693_v50 = vsel %vm692_vm12, %v1265_v29, %v689_v38  ;;  %v745_v63 = vadd.f32 %v1267_v45, %v744_v1 }
 0x2a1   : > { %vm786_vm13 = vweird.f32 %v1846_v48  ;;  %v819_v7 = vadd.f32 0.0036580483, %v818_v61  ;;  %v1269_v26 = vpop.eup %1268  ;;  %v659_v15 = vmul.f32 %v658_v13, %v634_v16  ;;  %v698_v3 = vsel %vm1839_vm5, %v697_v53, %v693_v50 }
 0x2a2   : > { %v830_v27 = vadd.f32 0.014752088, %v829_v47  ;;  %v867_v19 = vmul.f32 3.8918573e-05, %v1836_v39  ;;  %v699_v22 = vmul.f32 %v698_v3, %v674_v28  ;;  %v749_v4 = vsel %vm748_vm14, %v1267_v45, %v745_v63 }
 0x2a3   : > { %v782_v23 = vmul.f32 %v1269_v26, %v1846_v48  ;;  %v790_v6 = vand.u32 2147483647, %v1846_v48  ;;  %v1128_v29 = vclamps-f32 %v659_v15, 1.0  ;;  %v754_v16 = vsel %vm1854_vm9, %v753_v43, %v749_v4 }
 0x2a4   : > { %v831_v25 = vmul.f32 %v830_v27, %v1822_v20  ;;  %v858_v30 = vmul.f32 %v857_v11, %v1836_v39  ;;  %v1129_v35 = vclamps-f32 %v699_v22, 1.0  ;;  %v755_v32 = vmul.f32 %v754_v16, %v1827_v24 }
 0x2a5   : > { %v783_v34 = vsub.f32 1.0, %v782_v23  ;;  %v820_v28 = vmul.f32 %v819_v7, %v1822_v20  ;;  %v702_v40 = vadd.f32 1.0, %v1128_v29  ;;  %v793_v41 = vor.u32 1.1754944e-38, %v792_v37 }
 0x2a6   : > { %v832_v21 = vadd.f32 0.112945676, %v831_v25  ;;  %v868_v44 = vadd.f32 0.001143296, %v867_v19  ;;  %v703_v45 = vadd.f32 1.0, %v1129_v35  ;;  %v1132_v46 = vclamps-f32 %v755_v32, 1.0 }
 0x2a7   : > { %v784_v49 = vmul.f32 %v1269_v26, %v783_v34  ;;  %vm787_vm15 = vweird.f32 %v1269_v26  ;;  %v704_v51 = vmul.f32 %v702_v40, %v1793_v8  ;;  %v859_v53 = vadd.f32 0.0036580483, %v858_v30 }
 0x2a8   : > { %v833_v52 = vmul.f32 %v832_v21, %v1822_v20  ;;  %v869_v54 = vmul.f32 %v868_v44, %v1836_v39  ;;  %v705_v24 = vmul.f32 %v703_v45, %v1801_v12  ;;  %v798_v56 = vadd.f32 1.0, %v1132_v46  ;;  %vm788_vm0 = vmor %vm786_vm13, %vm787_vm15 }
 0x2a9   : > { %v785_v55 = vadd.f32 %v1269_v26, %v784_v49  ;;  %v821_v57 = vadd.f32 0.05243302, %v820_v28  ;;  %706 = vst [vmem:[%s1886_s21] sm:$0xff] %v704_v51  ;;  %v770_v58 = vmul.f32 %v769_v36, %v1712_v33  ;;  %v1893_v61 = vmul.f32 0.70710677, %v1815_v17 }
 0x2aa   : > { %v834_v8 = vadd.f32 0.4994258, %v833_v52  ;;  %v870_v60 = vadd.f32 0.014752088, %v869_v54  ;;  %707 = vst [vmem:[%s1886_s21 + $0x8] sm:$0xff] %v705_v24  ;;  %vm791_vm1 = vcmp.eq.f32.partialorder %v790_v6, 8.507059e+37  ;;  %v800_v42 = vmul.f32 %v798_v56, %v1807_v14 }
 0x2ab   : > { %v789_v12 = vsel %vm788_vm0, %v1269_v26, %v785_v55  ;;  %v1898_v62 = vmul.f32 0.70710677, %v1818_v18  ;;  %v860_v38 = vmul.f32 %v859_v53, %v1836_v39  ;;  %v910_v1 = vmul.f32 %v1893_v61, %v1893_v61 }
 0x2ac   : > { %v794_v43 = vsel %vm791_vm1, %v793_v41, %v789_v12  ;;  %v835_v0 = vmul.f32 %v834_v8, %v1822_v20  ;;  %v871_v33 = vmul.f32 %v870_v60, %v1836_v39  ;;  %1134 = vst [vmem:[%s1886_s21 + $0x10] sm:$0xff] %v800_v42  ;;  %v822_v14 = vmul.f32 %v821_v57, %v1822_v20 }
 0x2ad   : > { %v795_v48 = vmul.f32 %v794_v43, %v770_v58  ;;  %v950_v36 = vmul.f32 %v1898_v62, %v1898_v62  ;;  %v1909_v11 = vmin.f32 %v910_v1, 16.0  ;;  %v715_v50 = vmul.f32 0.5, %v1700_v31 }
 0x2ae   : > { %v836_v10 = vadd.f32 1.0, %v835_v0  ;;  %v872_v37 = vadd.f32 0.112945676, %v871_v33  ;;  %v861_v7 = vadd.f32 0.05243302, %v860_v38 }
 0x2af   : > { %v1133_v47 = vclamps-f32 %v795_v48, 1.0  ;;  %v1911_v13 = vmin.f32 %v950_v36, 16.0  ;;  %v912_v15 = vmul.f32 2.1237322e-06, %v1909_v11  ;;  %v823_v3 = vadd.f32 0.18741608, %v822_v14 }
 0x2b0   : > { %1270 = vrcp.f32 %v836_v10  ;;  %v873_v26 = vmul.f32 %v872_v37, %v1836_v39  ;;  %v923_v27 = vmul.f32 3.8918573e-05, %v1909_v11  ;;  %v862_v31 = vmul.f32 %v861_v7, %v1836_v39 }
 0x2b1   : > { %v799_v63 = vadd.f32 1.0, %v1133_v47  ;;  %v952_v19 = vmul.f32 2.1237322e-06, %v1911_v13  ;;  %v913_v23 = vadd.f32 0.00028619796, %v912_v15  ;;  %v824_v32 = vmul.f32 %v823_v3, %v1822_v20 }
 0x2b2   : > { %v874_v4 = vadd.f32 0.4994258, %v873_v26  ;;  %v963_v6 = vmul.f32 3.8918573e-05, %v1911_v13  ;;  %v924_v29 = vadd.f32 0.001143296, %v923_v27  ;;  %vm842_vm3 = vweird.f32 %v836_v10 }
 0x2b3   : > { %v801_v22 = vmul.f32 %v799_v63, %v715_v50  ;;  %v953_v16 = vadd.f32 0.00028619796, %v952_v19  ;;  %v914_v34 = vmul.f32 %v913_v23, %v1909_v11  ;;  %v863_v49 = vadd.f32 0.18741608, %v862_v31 }
 0x2b4   : > { %v875_v25 = vmul.f32 %v874_v4, %v1836_v39  ;;  %v964_v30 = vadd.f32 0.001143296, %v963_v6  ;;  %v925_v28 = vmul.f32 %v924_v29, %v1909_v11  ;;  %v825_v51 = vadd.f32 1.1283791, %v824_v32 }
 0x2b5   : > { %1135 = vst [vmem:[%s1886_s21 + $0x18] sm:$0xff] %v801_v22  ;;  %v954_v44 = vmul.f32 %v953_v16, %v1911_v13  ;;  %v848_v52 = vand.u32 2147483648, %v836_v10  ;;  %v915_v53 = vadd.f32 0.0036580483, %v914_v34  ;;  %v846_v24 = vand.u32 2147483647, %v836_v10 }
 0x2b6   : > { %v1271_v35 = vpop.eup %1270  ;;  %v876_v41 = vadd.f32 1.0, %v875_v25  ;;  %v926_v21 = vadd.f32 0.014752088, %v925_v28  ;;  %v965_v45 = vmul.f32 %v964_v30, %v1911_v13  ;;  %v864_v12 = vmul.f32 %v863_v49, %v1836_v39 }
 0x2b7   : > { %v838_v40 = vmul.f32 %v1271_v35, %v836_v10  ;;  %vm843_vm2 = vweird.f32 %v1271_v35  ;;  %v955_v57 = vadd.f32 0.0036580483, %v954_v44  ;;  %v849_v60 = vor.u32 1.1754944e-38, %v848_v52 }
 0x2b8   : > { %1272 = vrcp.f32 %v876_v41  ;;  %v927_v54 = vmul.f32 %v926_v21, %v1909_v11  ;;  %v966_v55 = vadd.f32 0.014752088, %v965_v45  ;;  %vm844_vm4 = vmor %vm842_vm3, %vm843_vm2  ;;  %v916_v42 = vmul.f32 %v915_v53, %v1909_v11 }
 0x2b9   : > { %v839_v46 = vsub.f32 1.0, %v838_v40  ;;  %v826_v33 = vmul.f32 %v825_v51, %v1773_v59  ;;  %vm847_vm5 = vcmp.eq.f32.partialorder %v846_v24, 8.507059e+37  ;;  %v956_v14 = vmul.f32 %v955_v57, %v1911_v13 }
 0x2ba   : > { %v928_v56 = vadd.f32 0.112945676, %v927_v54  ;;  %v967_v8 = vmul.f32 %v966_v55, %v1911_v13  ;;  %v865_v50 = vadd.f32 1.1283791, %v864_v12  ;;  %v917_v63 = vadd.f32 0.05243302, %v916_v42 }
 0x2bb   : > { %v840_v20 = vmul.f32 %v1271_v35, %v839_v46  ;;  %v888_v26 = vand.u32 2147483648, %v876_v41  ;;  %v886_v27 = vand.u32 2147483647, %v876_v41  ;;  %v957_v19 = vadd.f32 0.05243302, %v956_v14 }
 0x2bc   : > { %v929_v43 = vmul.f32 %v928_v56, %v1909_v11  ;;  %v968_v38 = vadd.f32 0.112945676, %v967_v8  ;;  %v810_v22 = vmul.f32 0.5, %v1749_v2  ;;  %vm882_vm7 = vweird.f32 %v876_v41 }
 0x2bd   : > { %v841_v58 = vadd.f32 %v1271_v35, %v840_v20  ;;  %v918_v16 = vmul.f32 %v917_v63, %v1909_v11  ;;  %v866_v31 = vmul.f32 %v865_v50, %v1788_v5  ;;  %v889_v25 = vor.u32 1.1754944e-38, %v888_v26 }
 0x2be   : > { %v1273_v0 = vpop.eup %1272  ;;  %v930_v37 = vadd.f32 0.4994258, %v929_v43  ;;  %v969_v47 = vmul.f32 %v968_v38, %v1911_v13  ;;  %vm887_vm9 = vcmp.eq.f32.partialorder %v886_v27, 8.507059e+37  ;;  %v958_v32 = vmul.f32 %v957_v19, %v1911_v13 }
 0x2bf   : > { %v845_v48 = vsel %vm844_vm4, %v1271_v35, %v841_v58  ;;  %v878_v36 = vmul.f32 %v1273_v0, %v876_v41  ;;  %vm883_vm6 = vweird.f32 %v1273_v0  ;;  %v919_v40 = vadd.f32 0.18741608, %v918_v16 }
 0x2c0   : > { %v850_v1 = vsel %vm847_vm5, %v849_v60, %v845_v48  ;;  %v931_v15 = vmul.f32 %v930_v37, %v1909_v11  ;;  %v970_v3 = vadd.f32 0.4994258, %v969_v47  ;;  %vm884_vm8 = vmor %vm882_vm7, %vm883_vm6  ;;  %v959_v21 = vadd.f32 0.18741608, %v958_v32 }
 0x2c1   : > { %v851_v10 = vmul.f32 %v850_v1, %v826_v33  ;;  %v879_v39 = vsub.f32 1.0, %v878_v36  ;;  %v811_v5 = vmul.f32 0.5, %v1752_v9  ;;  %v920_v46 = vmul.f32 %v919_v40, %v1909_v11 }
 0x2c2   : > { %v932_v23 = vadd.f32 1.0, %v931_v15  ;;  %v971_v6 = vmul.f32 %v970_v3, %v1911_v13  ;;  %v960_v54 = vmul.f32 %v959_v21, %v1911_v13  ;;  %v906_v37 = vmul.f32 0.5, %v1815_v17 }
 0x2c3   : > { %v1138_v7 = vclamps-f32 %v851_v10, 1.0  ;;  %v880_v59 = vmul.f32 %v1273_v0, %v879_v39  ;;  %v921_v55 = vadd.f32 1.1283791, %v920_v46 }
 0x2c4   : > { %1274 = vrcp.f32 %v932_v23  ;;  %v972_v2 = vadd.f32 1.0, %v971_v6  ;;  %v944_v20 = vand.u32 2147483648, %v932_v23  ;;  %v942_v57 = vand.u32 2147483647, %v932_v23 }
 0x2c5   : > { %v894_v4 = vadd.f32 1.0, %v1138_v7  ;;  %v881_v29 = vadd.f32 %v1273_v0, %v880_v59  ;;  %vm938_vm11 = vweird.f32 %v932_v23  ;;  %v961_v9 = vadd.f32 1.1283791, %v960_v54 }
 0x2c6   : > { %1276 = vrcp.f32 %v972_v2  ;;  %v984_v60 = vand.u32 2147483648, %v972_v2  ;;  %v945_v11 = vor.u32 1.1754944e-38, %v944_v20  ;;  %v982_v42 = vand.u32 2147483647, %v972_v2 }
 0x2c7   : > { %v896_v30 = vmul.f32 %v894_v4, %v810_v22  ;;  %v885_v35 = vsel %vm884_vm8, %v1273_v0, %v881_v29  ;;  %v922_v13 = vmul.f32 %v921_v55, %v1893_v61  ;;  %vm943_vm14 = vcmp.eq.f32.partialorder %v942_v57, 8.507059e+37 }
 0x2c8   : > { %v890_v34 = vsel %vm887_vm9, %v889_v25, %v885_v35  ;;  %vm978_vm15 = vweird.f32 %v972_v2  ;;  %v985_v38 = vor.u32 1.1754944e-38, %v984_v60  ;;  %v962_v1 = vmul.f32 %v961_v9, %v1898_v62 }
 0x2c9   : > { %1140 = vst [vmem:[%s1886_s21 + $0x20] sm:$0xff] %v896_v30  ;;  %v891_v28 = vmul.f32 %v890_v34, %v866_v31  ;;  %vm983_vm1 = vcmp.eq.f32.partialorder %v982_v42, 8.507059e+37  ;;  %v907_v62 = vmul.f32 0.5, %v1818_v18 }
 0x2ca   : > { %v1275_v44 = vpop.eup %1274 }
 0x2cb   : > { %v1139_v41 = vclamps-f32 %v891_v28, 1.0  ;;  %v934_v49 = vmul.f32 %v1275_v44, %v932_v23  ;;  %vm939_vm10 = vweird.f32 %v1275_v44 }
 0x2cc   : > { %v1277_v51 = vpop.eup %1276  ;;  %vm940_vm12 = vmor %vm938_vm11, %vm939_vm10 }
 0x2cd   : > { %v895_v45 = vadd.f32 1.0, %v1139_v41  ;;  %v935_v53 = vsub.f32 1.0, %v934_v49  ;;  %v974_v24 = vmul.f32 %v1277_v51, %v972_v2  ;;  %vm979_vm13 = vweird.f32 %v1277_v51 }
 0x2ce   : > { %vm980_vm0 = vmor %vm978_vm15, %vm979_vm13 }
 0x2cf   : > { %v897_v52 = vmul.f32 %v895_v45, %v811_v5  ;;  %v936_v56 = vmul.f32 %v1275_v44, %v935_v53  ;;  %v975_v58 = vsub.f32 1.0, %v974_v24 }
 0x2d1   : > { %1141 = vst [vmem:[%s1886_s21 + $0x28] sm:$0xff] %v897_v52  ;;  %v937_v8 = vadd.f32 %v1275_v44, %v936_v56  ;;  %v976_v12 = vmul.f32 %v1277_v51, %v975_v58 }
 0x2d3   : > { %v941_v43 = vsel %vm940_vm12, %v1275_v44, %v937_v8  ;;  %v977_v33 = vadd.f32 %v1277_v51, %v976_v12 }
 0x2d4   : > { %v946_v0 = vsel %vm943_vm14, %v945_v11, %v941_v43 }
 0x2d5   : > { %v947_v48 = vmul.f32 %v946_v0, %v922_v13  ;;  %v981_v36 = vsel %vm980_vm0, %v1277_v51, %v977_v33 }
 0x2d6   : > { %v986_v10 = vsel %vm983_vm1, %v985_v38, %v981_v36 }
 0x2d7   : > { %v1144_v14 = vclamps-f32 %v947_v48, 1.0  ;;  %v987_v61 = vmul.f32 %v986_v10, %v962_v1 }
 0x2d9   : > { %v990_v47 = vadd.f32 1.0, %v1144_v14  ;;  %v1145_v50 = vclamps-f32 %v987_v61, 1.0 }
 0x2db   : > { %v992_v39 = vmul.f32 %v990_v47, %v906_v37  ;;  %v991_v63 = vadd.f32 1.0, %v1145_v50 }
 0x2dd   : > { %1146 = vst [vmem:[%s1886_s21 + $0x30] sm:$0xff] %v992_v39  ;;  %v993_v7 = vmul.f32 %v991_v63, %v907_v62 }
 0x2df   : > { %1147 = vst [vmem:[%s1886_s21 + $0x38] sm:$0xff] %v993_v7 }
 0x2e0   : > { %1365 = shalt.err (!%p1362_p9)
}
 0x2e1   : > { %s1422_s29 = smov 256   ;;  %s1423_s15 = smov 16  }
 0x2e2   : > { %1161 = dma.vmem_to_hbm [thread:$0]  (%p1499_p13), %s1010_s16, 1024, %s1012_s4, %s997_s5, %s1422_s29, %s1422_s29, %s1423_s15  }
 0x2e3 PF: > { %s1026_s18 = sand.u32 1, %s1396_s9   ;;  %p2008_p10 = scmp.ge.s32.totalorder %s1408_s12, 2 }
 0x2e4   : > { %s1027_s19 = scalar_lea.sflag [#allocation4], %s1026_s18 }
 0x2e5   : > { %p1172_p11 = pnand %p2008_p10, %p1504_p4 }
 0x2e7   : > { %p1173_p0 = pneg %p1172_p11 }
 0x2e9   : > { %1391 = dma.done.wait (%p1173_p0), %s1027_s19, 1024  }
 0x2ea   : > { %1393 = vsyncadd (%p1173_p0), %s1027_s19, 4294966272  ;;  %p16_p2 = scmp.ge.s32.totalorder %s1479_s23, 4   ;;  %s2009_s9 = smov %s1400_s10 }
 0x2eb   : > { %s2010_s10 = smov %s1404_s11  ;;  %s2011_s11 = smov %s1491_s26 }
 0x2ec   : > { %s2012_s12 = smov %s1479_s23  ;;  %18 = sbr.rel (!%p16_p2) target bundleno = 6 (0x6), region = 83 }
 0x2f1   :  { %1033 = vsyncpa [#allocation3], 1 }
 0x2f2   :  { %1035 = vsyncpa [#allocation3 + $0x1], 1 }
 0x2f3   :  { %1036 = vsyncpa [#allocation6], 1 }
 0x2f4   :  { %1037 = vsyncpa [#allocation4], 1 }
 0x2f5   :  { %1039 = vsyncpa [#allocation4 + $0x1], 1 }

</bundles_post_ra>
